<compile_context>
chip_gen: v5e
topology: v5e:2x2
jax: 0.10.0
libtpu: 0.0.40
codegen_flags: <defaults>
</compile_context>

<pallas_src>
import functools

import jax
import jax.numpy as jnp
from jax.experimental import pallas as pl
from jax.experimental.pallas import tpu as pltpu


# ---------------------------------------------------------------------------
# In-kernel math helpers
# ---------------------------------------------------------------------------

def _softmax_triu_and_loss(adj):
    """Row softmax + upper-triangular mask + causal-constraint loss.

    Uses the triu trace identity: for upper-triangular A,
    (A @ A)[i, i] = A[i, i]^2, so trace(I + A@A) = D + sum_i diag(A)^2.
    No MXU matmul needed.
    """
    adj = adj.astype(jnp.float32)
    d = adj.shape[0]

    m = jnp.max(adj, axis=1, keepdims=True)
    e = jnp.exp(adj - m)
    s = e / jnp.sum(e, axis=1, keepdims=True)          # softmax(dim=1)

    row = jax.lax.broadcasted_iota(jnp.int32, (d, d), 0)
    col = jax.lax.broadcasted_iota(jnp.int32, (d, d), 1)
    a = jnp.where(col >= row, s, 0.0)                  # torch.triu

    diag = jnp.where(col == row, s, 0.0)               # diag(A) == diag(softmax)
    loss = jnp.float32(d) + jnp.sum(diag * diag)
    return a, loss


def _block_matmuls(a_t, x_ref, o_ref, block_b):
    """out[b] = A^T @ clip[b] for each b in the batch block (MXU)."""
    def body(b, carry):
        o_ref[b] = jnp.dot(a_t, x_ref[b],
                           preferred_element_type=jnp.float32).astype(o_ref.dtype)
        return carry
    jax.lax.fori_loop(0, block_b, body, None, unroll=True)


# ---------------------------------------------------------------------------
# Kernels
# ---------------------------------------------------------------------------

def _fused_kernel(adj_ref, x_ref, o_ref, loss_ref, at_ref, *, block_b):
    """Single fused kernel (single-TensorCore path).

    Step 0 computes A^T into VMEM scratch and the scalar loss into SMEM;
    every step runs block_b (D,D)@(D,T) MXU matmuls on its batch block.
    """
    @pl.when(pl.program_id(0) == 0)
    def _():
        a, loss = _softmax_triu_and_loss(adj_ref[...])
        at_ref[...] = a.T                     # store A^T so the dot is untransposed
        loss_ref[0, 0] = loss

    _block_matmuls(at_ref[...], x_ref, o_ref, block_b)


def _adjacency_kernel(adj_ref, at_ref, loss_ref):
    """One-shot adjacency transform (megacore path only)."""
    a, loss = _softmax_triu_and_loss(adj_ref[...])
    at_ref[...] = a.T
    loss_ref[0, 0] = loss


def _aggregate_kernel(at_ref, x_ref, o_ref, *, block_b):
    """Batch-blocked aggregate (megacore path, "parallel" batch axis)."""
    _block_matmuls(at_ref[...], x_ref, o_ref, block_b)


# ---------------------------------------------------------------------------
# Sizing helpers (generation-aware)
# ---------------------------------------------------------------------------

def _vmem_limit_bytes():
    """Scoped-VMEM limit with headroom: ~48 MiB on v7x (64 MiB physical),
    64 MiB on v5e/v6e (128 MiB physical)."""
    cap = None
    try:
        cap = int(pltpu.get_tpu_info().vmem_capacity_bytes)
    except Exception:
        cap = None
    if not cap:
        cap = 64 * 1024 * 1024          # conservative fallback: v7x per-core VMEM
    return int(min(cap * 3 // 4, 64 * 1024 * 1024))


def _tensorcores_per_chip():
    """Best-effort megacore detection; any misdetection only changes which
    (both correct) code path is taken."""
    try:
        kind = jax.devices()[0].device_kind.lower()
    except Exception:
        return 1
    if "v7" in kind or "v4" in kind or "v5p" in kind:
        return 2
    return 1


def _pick_block_b(batch, d, t, itemsize, *, vmem_budget_bytes,
                  max_block=16, min_steps=3):
    """Largest divisor of `batch` (<= max_block) whose per-step footprint fits
    the VMEM budget while keeping at least `min_steps` grid steps (so the
    pipeline prologue/epilogue overlap and, on megacore, each core gets
    several steps).  Accounts for the double-buffered adjacency tile and the
    A^T scratch, not just the clip/out blocks."""
    best = 1
    for bb in range(1, min(max_block, batch) + 1):
        if batch % bb:
            continue
        if bb > 1 and batch // bb < min_steps:
            continue
        per_step = (4 * bb * d * t * itemsize      # clip-in + out, double-buffered
                    + 2 * d * d * 4                # adjacency / A^T input, double-buffered
                    + d * d * 4)                   # A^T VMEM scratch
        if per_step <= vmem_budget_bytes:
            best = bb
    return best


# ---------------------------------------------------------------------------
# Public wrapper
# ---------------------------------------------------------------------------

def causal_aggregate_forward(clip, adjacency, *, block_b=None):
    """Pallas TPU implementation of causal_aggregate.forward(clip).

    clip:      (B, D, T) float32, D == concept_dimension
    adjacency: (D, D) float32 raw (pre-softmax) parameter
    Returns (out, loss): out (B, D, T) float32, loss scalar float32.
    """
    bsz, d, t = clip.shape
    assert adjacency.shape == (d, d)
    adjacency = adjacency.astype(jnp.float32)

    vmem_limit = _vmem_limit_bytes()
    budget = max(4 * 1024 * 1024, vmem_limit - 4 * 1024 * 1024)
    n_cores = _tensorcores_per_chip()

    if block_b is None:
        block_b = _pick_block_b(bsz, d, t, clip.dtype.itemsize,
                                vmem_budget_bytes=budget,
                                max_block=16,
                                min_steps=3 * n_cores)
    assert bsz % block_b == 0
    grid = (bsz // block_b,)

    clip_spec = pl.BlockSpec((block_b, d, t), lambda i: (i, 0, 0))
    out_spec = pl.BlockSpec((block_b, d, t), lambda i: (i, 0, 0))  # lane-dense: T % 128 == 0
    adj_spec = pl.BlockSpec((d, d), lambda i: (0, 0))              # constant, resident

    if n_cores > 1:
        # Megacore (v7x / v4 / v5p): keep a tiny separate adjacency call so the
        # batch axis can stay "parallel" and shard across TensorCores (a
        # pl.when(i == 0) scratch init would only run on the core owning step 0).
        a_t, loss = pl.pallas_call(
            _adjacency_kernel,
            out_shape=(jax.ShapeDtypeStruct((d, d), jnp.float32),
                       jax.ShapeDtypeStruct((1, 1), jnp.float32)),
            in_specs=[pl.BlockSpec(memory_space=pltpu.MemorySpace.VMEM)],
            out_specs=(pl.BlockSpec(memory_space=pltpu.MemorySpace.VMEM),
                       pl.BlockSpec(memory_space=pltpu.MemorySpace.SMEM)),
        )(adjacency)

        out = pl.pallas_call(
            functools.partial(_aggregate_kernel, block_b=block_b),
            out_shape=jax.ShapeDtypeStruct((bsz, d, t), clip.dtype),
            grid_spec=pltpu.PrefetchScalarGridSpec(
                num_scalar_prefetch=0,
                grid=grid,
                in_specs=[adj_spec, clip_spec],
                out_specs=out_spec,
            ),
            compiler_params=pltpu.CompilerParams(
                dimension_semantics=("parallel",),
                vmem_limit_bytes=vmem_limit,
            ),
        )(a_t, clip)
        return out, loss[0, 0]

    # Single-TensorCore chips (v5e / v6e): one fully fused pallas_call.
    out, loss = pl.pallas_call(
        functools.partial(_fused_kernel, block_b=block_b),
        out_shape=(jax.ShapeDtypeStruct((bsz, d, t), clip.dtype),
                   jax.ShapeDtypeStruct((1, 1), jnp.float32)),
        grid_spec=pltpu.PrefetchScalarGridSpec(
            num_scalar_prefetch=0,
            grid=grid,
            in_specs=[adj_spec, clip_spec],
            out_specs=(out_spec,
                       pl.BlockSpec((1, 1), lambda i: (0, 0),
                                    memory_space=pltpu.MemorySpace.SMEM)),
            scratch_shapes=[pltpu.VMEM((d, d), jnp.float32)],   # A^T, persists across steps
        ),
        compiler_params=pltpu.CompilerParams(
            # "arbitrary" is required for the pl.when(i==0) scratch-init pattern.
            dimension_semantics=("arbitrary",),
            vmem_limit_bytes=vmem_limit,
        ),
    )(adjacency, clip)
    return out, loss[0, 0]


# ---------------------------------------------------------------------------
# Pure-JAX reference (matches the PyTorch module)
# ---------------------------------------------------------------------------

def reference_forward(clip, adjacency):
    d = adjacency.shape[0]
    a = jnp.triu(jax.nn.softmax(adjacency, axis=1))
    loss = jnp.trace(jnp.eye(d, dtype=jnp.float32) + a @ a)
    out = jnp.transpose(jnp.transpose(clip, (0, 2, 1)) @ a, (0, 2, 1))
    return out, loss


if __name__ == "__main__":
    concept_dimension = 128   # D
    batch = 8                 # B
    seq = 256                 # T (lane-dense last dim, multiple of 128)

    key = jax.random.PRNGKey(0)
    k_clip, k_adj = jax.random.split(key)

    clip = jax.random.normal(k_clip, (batch, concept_dimension, seq), jnp.float32)
    # Parameter initialized like the module (triu of ones) plus a small
    # deterministic perturbation so the lower triangle also exercises the
    # softmax denominator.
    adjacency = (jnp.triu(jnp.ones((concept_dimension, concept_dimension),
                                   jnp.float32))
                 + 0.05 * jax.random.normal(
                     k_adj, (concept_dimension, concept_dimension), jnp.float32))

    out, loss = causal_aggregate_forward(clip, adjacency)
    out, loss = jax.block_until_ready((out, loss))

    ref_out, ref_loss = reference_forward(clip, adjacency)
    assert out.shape == (batch, concept_dimension, seq)
    assert jnp.allclose(out, ref_out, atol=2e-3, rtol=2e-3)
    assert jnp.allclose(loss, ref_loss, atol=2e-3, rtol=2e-3)
    print("KERNEL_OK")
</pallas_src>

<mosaic_0001>
module attributes {stable_mosaic.version = 11 : i64} {
  func.func @_fused_kernel(%arg0: i32, %arg1: memref<128x128xf32, #tpu.memory_space<vmem>>, %arg2: memref<2x128x256xf32, #tpu.memory_space<vmem>>, %arg3: memref<2x128x256xf32, #tpu.memory_space<vmem>>, %arg4: memref<1x1xf32, #tpu.memory_space<smem>>, %arg5: memref<128x128xf32, #tpu.memory_space<vmem>>) attributes {dimension_semantics = [#tpu.dimension_semantics<arbitrary>], iteration_bounds = array<i64: 4>, scalar_prefetch = 0 : i64, scratch_operands = 1 : i64, tpu.core_type = #tpu.core_type<tc>, window_params = [{pipeline_mode = #tpu.pipeline_mode<synchronous>, transform_indices = @transform_0, window_bounds = array<i64: 128, 128>}, {transform_indices = @transform_1, window_bounds = array<i64: 2, 128, 256>}, {transform_indices = @transform_2, window_bounds = array<i64: 2, 128, 256>}, {transform_indices = @transform_3, window_bounds = array<i64: 1, 1>}]} {
    %c0_i32 = arith.constant 0 : i32
    %0 = arith.cmpi eq, %arg0, %c0_i32 : i32
    %1 = arith.extui %0 : i1 to i32
    %c0_i32_0 = arith.constant 0 : i32
    %2 = arith.cmpi ne, %1, %c0_i32_0 : i32
    scf.if %2 {
      %c0_12 = arith.constant 0 : index
      %c0_13 = arith.constant 0 : index
      %20 = vector.load %arg1[%c0_12, %c0_13] : memref<128x128xf32, #tpu.memory_space<vmem>>, vector<128x128xf32>
      %cst_14 = arith.constant dense<0xFF800000> : vector<128xf32>
      %21 = vector.multi_reduction <maximumf>, %20, %cst_14 [1] : vector<128x128xf32> to vector<128xf32>
      %22 = vector.shape_cast %21 : vector<128xf32> to vector<128x1xf32>
      %23 = vector.broadcast %22 : vector<128x1xf32> to vector<128x128xf32>
      %24 = arith.subf %20, %23 : vector<128x128xf32>
      %25 = math.exp %24 : vector<128x128xf32>
      %cst_15 = arith.constant dense<0.000000e+00> : vector<128xf32>
      %26 = vector.multi_reduction <add>, %25, %cst_15 [1] : vector<128x128xf32> to vector<128xf32>
      %27 = vector.shape_cast %26 : vector<128xf32> to vector<128x1xf32>
      %28 = vector.broadcast %27 : vector<128x1xf32> to vector<128x128xf32>
      %29 = arith.divf %25, %28 : vector<128x128xf32>
      %30 = tpu.iota {dimensions = array<i32: 0>} : vector<128x128xi32>
      %31 = tpu.iota {dimensions = array<i32: 1>} : vector<128x128xi32>
      %32 = arith.cmpi sge, %31, %30 : vector<128x128xi32>
      %cst_16 = arith.constant 0.000000e+00 : f32
      %33 = vector.broadcast %cst_16 : f32 to vector<128x128xf32>
      %34 = arith.select %32, %29, %33 : vector<128x128xi1>, vector<128x128xf32>
      %35 = arith.cmpi eq, %31, %30 : vector<128x128xi32>
      %cst_17 = arith.constant 0.000000e+00 : f32
      %36 = vector.broadcast %cst_17 : f32 to vector<128x128xf32>
      %37 = arith.select %35, %29, %36 : vector<128x128xi1>, vector<128x128xf32>
      %38 = arith.mulf %37, %37 : vector<128x128xf32>
      %39 = vector.shape_cast %38 : vector<128x128xf32> to vector<1x128x128xf32>
      %cst_18 = arith.constant dense<0.000000e+00> : vector<1xf32>
      %40 = vector.multi_reduction <add>, %39, %cst_18 [1, 2] : vector<1x128x128xf32> to vector<1xf32>
      %41 = vector.shape_cast %40 : vector<1xf32> to vector<1x1x1xf32>
      %42 = vector.extract %41[0, 0, 0] : f32 from vector<1x1x1xf32>
      %cst_19 = arith.constant 1.280000e+02 : f32
      %43 = arith.addf %cst_19, %42 : f32
      %44 = tpu.transpose %34, [1, 0] : vector<128x128xf32> -> vector<128x128xf32>
      %c0_20 = arith.constant 0 : index
      %c0_21 = arith.constant 0 : index
      %45 = vector.load %arg5[%c0_20, %c0_21] : memref<128x128xf32, #tpu.memory_space<vmem>>, vector<128x128xf32>
      tpu.vector_store %arg5[%c0_20, %c0_21], %44 {strides = array<i32>} : memref<128x128xf32, #tpu.memory_space<vmem>>, vector<128x128xf32>,
      %c0_22 = arith.constant 0 : index
      %c0_23 = arith.constant 0 : index
      %46 = memref.load %arg4[%c0_22, %c0_23] : memref<1x1xf32, #tpu.memory_space<smem>>
      memref.store %43, %arg4[%c0_22, %c0_23] : memref<1x1xf32, #tpu.memory_space<smem>>
    } else {
    }
    %c0 = arith.constant 0 : index
    %c0_1 = arith.constant 0 : index
    %3 = vector.load %arg5[%c0, %c0_1] : memref<128x128xf32, #tpu.memory_space<vmem>>, vector<128x128xf32>
    %c0_i32_2 = arith.constant 0 : i32
    %4 = arith.index_cast %c0_i32_2 : i32 to index
    %c0_3 = arith.constant 0 : index
    %c0_4 = arith.constant 0 : index
    %5 = vector.load %arg2[%4, %c0_3, %c0_4] : memref<2x128x256xf32, #tpu.memory_space<vmem>>, vector<1x128x256xf32>
    %6 = vector.shape_cast %5 : vector<1x128x256xf32> to vector<128x256xf32>
    %cst = arith.constant dense<0.000000e+00> : vector<128x256xf32>
    %7 = tpu.matmul %3, %6, %cst {dimension_numbers = #tpu.dot_dimension_numbers<[1], [0], [0], [1], [0, 0, 1, 1], [], []>} : vector<128x128xf32>, vector<128x256xf32>, vector<128x256xf32> -> vector<128x256xf32>
    %8 = arith.index_cast %c0_i32_2 : i32 to index
    %c0_5 = arith.constant 0 : index
    %c0_6 = arith.constant 0 : index
    %9 = vector.load %arg3[%8, %c0_5, %c0_6] : memref<2x128x256xf32, #tpu.memory_space<vmem>>, vector<1x128x256xf32>
    %10 = vector.shape_cast %9 : vector<1x128x256xf32> to vector<128x256xf32>
    %11 = vector.shape_cast %7 : vector<128x256xf32> to vector<1x128x256xf32>
    tpu.vector_store %arg3[%8, %c0_5, %c0_6], %11 {strides = array<i32>} : memref<2x128x256xf32, #tpu.memory_space<vmem>>, vector<1x128x256xf32>,
    %c1_i32 = arith.constant 1 : i32
    %12 = arith.index_cast %c1_i32 : i32 to index
    %c0_7 = arith.constant 0 : index
    %c0_8 = arith.constant 0 : index
    %13 = vector.load %arg2[%12, %c0_7, %c0_8] : memref<2x128x256xf32, #tpu.memory_space<vmem>>, vector<1x128x256xf32>
    %14 = vector.shape_cast %13 : vector<1x128x256xf32> to vector<128x256xf32>
    %cst_9 = arith.constant dense<0.000000e+00> : vector<128x256xf32>
    %15 = tpu.matmul %3, %14, %cst_9 {dimension_numbers = #tpu.dot_dimension_numbers<[1], [0], [0], [1], [0, 0, 1, 1], [], []>} : vector<128x128xf32>, vector<128x256xf32>, vector<128x256xf32> -> vector<128x256xf32>
    %16 = arith.index_cast %c1_i32 : i32 to index
    %c0_10 = arith.constant 0 : index
    %c0_11 = arith.constant 0 : index
    %17 = vector.load %arg3[%16, %c0_10, %c0_11] : memref<2x128x256xf32, #tpu.memory_space<vmem>>, vector<1x128x256xf32>
    %18 = vector.shape_cast %17 : vector<1x128x256xf32> to vector<128x256xf32>
    %19 = vector.shape_cast %15 : vector<128x256xf32> to vector<1x128x256xf32>
    tpu.vector_store %arg3[%16, %c0_10, %c0_11], %19 {strides = array<i32>} : memref<2x128x256xf32, #tpu.memory_space<vmem>>, vector<1x128x256xf32>,
    %c2_i32 = arith.constant 2 : i32
    return
  }
  func.func @transform_0(%arg0: i32) -> (i32, i32) {
    %c0_i32 = arith.constant 0 : i32
    %c0_i32_0 = arith.constant 0 : i32
    %c0_i32_1 = arith.constant 0 : i32
    return %c0_i32, %c0_i32_0 : i32, i32
  }
  func.func @transform_1(%arg0: i32) -> (i32, i32, i32) {
    %c0_i32 = arith.constant 0 : i32
    %c0_i32_0 = arith.constant 0 : i32
    %c0_i32_1 = arith.constant 0 : i32
    return %arg0, %c0_i32, %c0_i32_0 : i32, i32, i32
  }
  func.func @transform_2(%arg0: i32) -> (i32, i32, i32) {
    %c0_i32 = arith.constant 0 : i32
    %c0_i32_0 = arith.constant 0 : i32
    %c0_i32_1 = arith.constant 0 : i32
    return %arg0, %c0_i32, %c0_i32_0 : i32, i32, i32
  }
  func.func @transform_3(%arg0: i32) -> (i32, i32) {
    %c0_i32 = arith.constant 0 : i32
    %c0_i32_0 = arith.constant 0 : i32
    %c0_i32_1 = arith.constant 0 : i32
    return %c0_i32, %c0_i32_0 : i32, i32
  }
}

</mosaic_0001>

<bundles_post_ra>
// kernel: tpu_custom_call.1
= control target key start
LH: loop header
LB: loop body
LE: loop exit
PB: predicated region body
PF: predicated region fallthrough
CT: control target
= control target key end

     0   :  { %9 = vsyncpa [#allocation4], 0  ;;  %s2651_s0 = inlined_call_operand.hbm [shape: f32[128,128], index: 0, kind: input, shape index: {}]   ;;  %s2652_s1 = inlined_call_operand.hbm [shape: f32[8,128,256], index: 1, kind: input, shape index: {}]   ;;  %s2653_s2 = inlined_call_operand.hbm [shape: f32[8,128,256], index: 2, kind: output, shape index: {0}]   ;;  %s2654_s3 = inlined_call_operand.hbm [shape: f32[1,1], index: 3, kind: output, shape index: {1}]  }
   0x1   :  { %10 = vsyncpa [#allocation8], 0 }
   0x2   :  { %12 = vsyncpa [#allocation8 + $0x1], 0 }
   0x3   :  { %13 = vsyncpa [#allocation5], 0 }
   0x4   :  { %15 = vsyncpa [#allocation5 + $0x1], 0 }
   0x5   :  { %16 = vsyncpa [#allocation6], 0  ;;  %s1692_s12 = smov 0   ;;  %s1694_s13 = smov 0  }
   0x6   :  { %s1696_s14 = smov 0   ;;  %s1698_s15 = smov 0  }
   0x7 LB: > { %s1713_s16 = sadd.s32 4294967295, %s1662_s15   ;;  %s1289_s17 = sadd.s32 4294967294, %s1662_s15   ;;  %s1662_s15 = sphi %s1698_s15, %s2721_s15   ;;  %s1658_s14 = sphi %s1696_s14, %s2720_s14   ;;  %s1654_s13 = sphi %s1694_s13, %s2719_s13   ;;  %s1650_s12 = sphi %s1692_s12, %s2718_s12  }
   0x8   : > { %p63_p0 = scmp.ne.s32.totalorder %s1654_s13, %s1650_s12  ;;  %p64_p1 = scmp.eq.s32.totalorder %s1713_s16, 0 }
   0x9   : > { %p2655_p2 = scmp.eq.s32.totalorder %s1713_s16, 3  ;;  %p93_p3 = scmp.eq.s32.totalorder %s1289_s17, 3 }
   0xa   : > { %p1722_p4 = por %p64_p1, %p63_p0  ;;  %p1290_p5 = scmp.ge.s32.totalorder %s1662_s15, 1 }
   0xb   : > { %p1727_p6 = por %p93_p3, %p63_p0  ;;  %p121_p7 = scmp.lt.s32.totalorder %s1662_s15, 5 }
   0xc   : > { %s132_s22 = sshll.u32 %s2651_s0, 4  ;;  %s1664_s24 = smov [#allocation3]   ;;  %s133_s22 = int_to_ptr.hbm [resolvable:$true] %s132_s22 }
   0xd   : > { %p1736_p9 = pnand %p1290_p5, %p121_p7  ;;  %s134_s25 = sshll.u32 %s1664_s24, 4  ;;  %s135_s25 = int_to_ptr.vmem [resolvable:$true] %s134_s25 }
   0xe   : > { %s1745_s26 = sadd.s32 1, %s1662_s15   ;;  %s1665_s27 = smov 128  }
   0xf   : > { %p1392_p10 = pneg %p1736_p9  ;;  %s1666_s28 = smov 8  }
  0x10   : > { %s47_s29 = ssub.s32 %s1662_s15, %s1745_s26  ;;  %s50_s30 = sadd.s32 1, %s1658_s14 }
  0x11   : > { %p1393_p11 = pnand %p1392_p10, %p64_p1  ;;  %p48_p12 = scmp.eq.s32.totalorder %s47_s29, 0 }
  0x12   : > { %p57_p13 = scmp.ne.s32.totalorder %s1658_s14, %s1654_s13  ;;  %p58_p0 = scmp.eq.s32.totalorder %s1662_s15, 0 }
  0x13   : > { %1395 = dma.hbm_to_vmem [thread:$0]  (!%p1393_p11), %s133_s22, 2048, %s135_s25, [#allocation4], %s1665_s27, %s1665_s27, %s1666_s28  }
  0x14   : > { %p1405_p3 = scmp.lt.s32.totalorder %s1662_s15, 4  ;;  %p59_p5 = por %p58_p0, %p57_p13 }
  0x15   : > { %s1755_s4 = scalar_select %p48_p12, %s1658_s14, %s50_s30  }
  0x16   : > { %p1759_p7 = por %p2655_p2, %p57_p13  ;;  %s148_s6 = sand.u32 1, %s1658_s14  }
  0x17   : > { %s1375_s7 = sshll.u32 %s1662_s15, 9  ;;  %s1293_s8 = sshll.u32 %s148_s6, 9 }
  0x18   : > { %s158_s11 = scalar_lea.hbm %s2652_s1, %s1375_s7  ;;  %s152_s20 = scalar_lea.vmem [#allocation7], %s1293_s8 }
  0x19   : > { %s159_s17 = sshll.u32 %s158_s11, 4  ;;  %s161_s21 = sshll.u32 %s152_s20, 4  ;;  %s160_s17 = int_to_ptr.hbm [resolvable:$true] %s159_s17  ;;  %s162_s21 = int_to_ptr.vmem [resolvable:$true] %s161_s21 }
  0x1a   : > { %p1770_p10 = pnand %p1405_p3, %p59_p5  ;;  %s149_s24 = scalar_lea.sflag [#allocation8], %s148_s6 }
  0x1b   : > { %s1544_s25 = sshra.s32 %s160_s17, 4  ;;  %s1551_s30 = scalar_lea.hbm %s2652_s1, 2048  ;;  %s1545_s25 = int_to_ptr.hbm [resolvable:$true] %s1544_s25 }
  0x1c   : > { %s1546_s27 = scalar_lea.hbm %s1545_s25, 512  ;;  %p1548_p12 = pneg %p1770_p10 }
  0x1d   : > { %p1547_p11 = scmp.ne.s32.totalorder %s1545_s25, %s1546_s27  ;;  %p1552_p3 = scmp.lt.s32.totalorder %s1545_s25, %s2652_s1 }
  0x1e   : > { %p1553_p5 = scmp.lt.s32.totalorder %s1551_s30, %s1546_s27 }
  0x1f   : > { %p1549_p13 = pnand %p1548_p12, %p1547_p11 }
  0x20   : > { %p1554_p2 = por %p1553_p5, %p1552_p3 }
  0x21   : > { %p1550_p0 = pneg %p1549_p13 }
  0x23   : > { %p1555_p8 = pnand %p1554_p2, %p1550_p0 }
  0x25   : > { %1558 = shalt.err (!%p1555_p8)
}
  0x26   : > { %s1667_s6 = smov 256   ;;  %s1668_s9 = smov 16  }
  0x27   : > { %1399 = dma.hbm_to_vmem [thread:$0]  (!%p1770_p10), %s160_s17, 8192, %s162_s21, %s149_s24, %s1667_s6, %s1667_s6, %s1668_s9  }
  0x28   : > { %173 = sbr.rel (%p1736_p9) target bundleno = 916 (0x394), region = 28 }
  0x2d   : > { %1633 = dma.done.wait (%p64_p1), [#allocation4], 2048  }
  0x2e   : > { %1635 = vsyncadd (%p64_p1), [#allocation4], 4294965248  ;;  %s1791_s10 = sand.u32 1, %s1654_s13  }
  0x2f   : > { %s1299_s11 = sshll.u32 %s1791_s10, 9  ;;  %s181_s20 = scalar_lea.sflag [#allocation8], %s1791_s10 }
  0x30   : > { %s1795_s25 = scalar_lea.vmem [#allocation7], %s1299_s11 }
  0x31   : > { %1637 = dma.done.wait (%p1722_p4), %s181_s20, 8192  }
  0x32   : > { %1639 = vsyncadd (%p1722_p4), %s181_s20, 4294959104  ;;  %s1801_s23 = scalar_lea.vmem [#allocation9], %s1299_s11  ;;  %p2662_p2 = scmp.ne.s32.totalorder %s1713_s16, 0 }
  0x34   : > { %213 = sbr.rel (%p2662_p2) target bundleno = 621 (0x26d), region = 40 }
  0x39   : > { %v218_v0 = vld [vmem:[#allocation3 + $0x20] sm:$0xff]  ;;  %v216_v1 = vld [vmem:[#allocation3 + $0x10] sm:$0xff]  ;;  %v219_v3 = vld [vmem:[#allocation3 + $0x28] sm:$0xff] }
  0x3a   : > { %v214_v2 = vld [vmem:[#allocation3] sm:$0xff]  ;;  %238 = vmax.xlane.f32.xlu2 %v218_v0  ;;  %234 = vmax.xlane.f32.xlu1 %v216_v1  ;;  %v217_v4 = vld [vmem:[#allocation3 + $0x18] sm:$0xff]  ;;  %v215_v5 = vld [vmem:[#allocation3 + $0x8] sm:$0xff] }
  0x3b   : > { %230 = vmax.xlane.f32.xlu0 %v214_v2  ;;  %v222_v6 = vld [vmem:[#allocation3 + $0x40] sm:$0xff]  ;;  %v1805_v7 = vld [vmem:[#allocation3 + $0x38] sm:$0xff]  ;;  %v220_v8 = vld [vmem:[#allocation3 + $0x30] sm:$0xff] }
  0x3c   : > { %v1808_v9 = vld [vmem:[#allocation3 + $0x58] sm:$0xff]  ;;  %v1810_v10 = vld [vmem:[#allocation3 + $0x50] sm:$0xff]  ;;  %v1812_v11 = vld [vmem:[#allocation3 + $0x48] sm:$0xff] }
  0x3d   : > { %v1817_v12 = vld [vmem:[#allocation3 + $0x70] sm:$0xff]  ;;  %v1819_v13 = vld [vmem:[#allocation3 + $0x68] sm:$0xff]  ;;  %v1821_v14 = vld [vmem:[#allocation3 + $0x60] sm:$0xff] }
  0x3e   : > { %v1826_v15 = vld [vmem:[#allocation3 + $0x78] sm:$0xff] }
  0x42   : > { %240 = vmax.xlane.f32.xlu2 %v219_v3  ;;  %236 = vmax.xlane.f32.xlu1 %v217_v4 }
  0x43   : > { %232 = vmax.xlane.f32.xlu0 %v215_v5 }
  0x4a   : > { %246 = vmax.xlane.f32.xlu2 %v222_v6  ;;  %244 = vmax.xlane.f32.xlu1 %v1805_v7 }
  0x4b   : > { %242 = vmax.xlane.f32.xlu0 %v220_v8 }
  0x52   : > { %252 = vmax.xlane.f32.xlu2 %v1808_v9  ;;  %250 = vmax.xlane.f32.xlu1 %v1810_v10 }
  0x53   : > { %248 = vmax.xlane.f32.xlu0 %v1812_v11 }
  0x5a   : > { %258 = vmax.xlane.f32.xlu2 %v1817_v12  ;;  %256 = vmax.xlane.f32.xlu1 %v1819_v13 }
  0x5b   : > { %254 = vmax.xlane.f32.xlu0 %v1821_v14 }
  0x63   : > { %260 = vmax.xlane.f32.xlu0 %v1826_v15 }
  0xad   : > { %v239_v16 = vpop.xlane.xlu2 %238  ;;  %v235_v17 = vpop.xlane.xlu1 %234 }
  0xae   : > { %v264_v18 = vsub.f32 %v216_v1, %v235_v17  ;;  %v231_v19 = vpop.xlane.xlu0 %230  ;;  %v266_v32 = vsub.f32 %v218_v0, %v239_v16 }
  0xaf   : > { %v262_v20 = vsub.f32 %v214_v2, %v231_v19 }
  0xb0   : > { %v282_v21 = vmul.f32 1.442695, %v264_v18  ;;  %v286_v35 = vmul.f32 1.442695, %v266_v32 }
  0xb1   : > { %v278_v22 = vmul.f32 1.442695, %v262_v20 }
  0xb2   : > { %1450 = vpow2.f32 %v282_v21 }
  0xb3   : > { %1452 = vpow2.f32 %v278_v22  ;;  %v582_v22 = vlaneseq }
  0xb5   : > { %v241_v23 = vpop.xlane.xlu2 %240  ;;  %v237_v24 = vpop.xlane.xlu1 %236 }
  0xb6   : > { %v267_v25 = vsub.f32 %v219_v3, %v241_v23  ;;  %v265_v26 = vsub.f32 %v217_v4, %v237_v24  ;;  %v233_v27 = vpop.xlane.xlu0 %232 }
  0xb7   : > { %v263_v28 = vsub.f32 %v215_v5, %v233_v27  ;;  %v1896_v27 = vand.u32 127, %v582_v22 }
  0xb8   : > { %v288_v29 = vmul.f32 1.442695, %v267_v25  ;;  %v284_v30 = vmul.f32 1.442695, %v265_v26  ;;  %v1829_v31 = vpop.eup %1450 }
  0xb9   : > { %v280_v33 = vmul.f32 1.442695, %v263_v28  ;;  %v1831_v34 = vpop.eup %1452  ;;  %314 = vadd.xlane.f32.xlu0 %v1829_v31 }
  0xba   : > { %1454 = vpow2.f32 %v288_v29  ;;  %310 = vadd.xlane.f32.xlu1 %v1831_v34  ;;  %v1899_v29 = vshrl.u32 %v582_v22, 7 }
  0xbb   : > { %1456 = vpow2.f32 %v284_v30 }
  0xbc   : > { %1458 = vpow2.f32 %v280_v33  ;;  %vm601_vm0 = vcmp.ge.s32.totalorder %v1896_v27, %v1899_v29  ;;  %vm633_vm5 = vcmp.eq.s32.totalorder %v1896_v27, %v1899_v29 }
  0xbd   : > { %v247_v36 = vpop.xlane.xlu2 %246  ;;  %v245_v37 = vpop.xlane.xlu1 %244  ;;  %1460 = vpow2.f32 %v286_v35 }
  0xbe   : > { %v270_v38 = vsub.f32 %v222_v6, %v247_v36  ;;  %v243_v39 = vpop.xlane.xlu0 %242  ;;  %v269_v45 = vsub.f32 %v1805_v7, %v245_v37 }
  0xbf   : > { %v268_v40 = vsub.f32 %v220_v8, %v243_v39  ;;  %v1909_v39 = vadd.s32 16, %v1899_v29 }
  0xc0   : > { %v1835_v41 = vpop.eup %1454  ;;  %v294_v42 = vmul.f32 1.442695, %v270_v38  ;;  %v292_v48 = vmul.f32 1.442695, %v269_v45 }
  0xc1   : > { %v1837_v43 = vpop.eup %1456  ;;  %v290_v44 = vmul.f32 1.442695, %v268_v40  ;;  %320 = vadd.xlane.f32.xlu0 %v1835_v41 }
  0xc2   : > { %v1840_v46 = vpop.eup %1458  ;;  %1462 = vpow2.f32 %v294_v42  ;;  %316 = vadd.xlane.f32.xlu1 %v1837_v43 }
  0xc3   : > { %1464 = vpow2.f32 %v290_v44  ;;  %312 = vadd.xlane.f32.xlu2 %v1840_v46  ;;  %v1846_v52 = vpop.eup %1460 }
  0xc4   : > { %1466 = vpow2.f32 %v292_v48 }
  0xc5   : > { %v253_v47 = vpop.xlane.xlu2 %252  ;;  %v251_v49 = vpop.xlane.xlu1 %250 }
  0xc6   : > { %v273_v50 = vsub.f32 %v1808_v9, %v253_v47  ;;  %v249_v51 = vpop.xlane.xlu0 %248  ;;  %v272_v58 = vsub.f32 %v1810_v10, %v251_v49 }
  0xc7   : > { %v271_v53 = vsub.f32 %v1812_v11, %v249_v51 }
  0xc8   : > { %v1849_v54 = vpop.eup %1462  ;;  %v300_v55 = vmul.f32 1.442695, %v273_v50  ;;  %v298_v60 = vmul.f32 1.442695, %v272_v58 }
  0xc9   : > { %v1851_v56 = vpop.eup %1464  ;;  %v296_v57 = vmul.f32 1.442695, %v271_v53  ;;  %326 = vadd.xlane.f32.xlu0 %v1849_v54 }
  0xca   : > { %1468 = vpow2.f32 %v300_v55  ;;  %322 = vadd.xlane.f32.xlu1 %v1851_v56  ;;  %v1858_v63 = vpop.eup %1466 }
  0xcb   : > { %1470 = vpow2.f32 %v296_v57  ;;  %318 = vadd.xlane.f32.xlu2 %v1846_v52  ;;  %v1929_v57 = vadd.s32 8, %v1899_v29 }
  0xcc   : > { %1472 = vpow2.f32 %v298_v60 }
  0xcd   : > { %v259_v59 = vpop.xlane.xlu2 %258  ;;  %v257_v1 = vpop.xlane.xlu1 %256  ;;  %vm602_vm11 = vcmp.ge.s32.totalorder %v1896_v27, %v1929_v57 }
  0xce   : > { %v276_v61 = vsub.f32 %v1817_v12, %v259_v59  ;;  %v255_v62 = vpop.xlane.xlu0 %254  ;;  %v275_v6 = vsub.f32 %v1819_v13, %v257_v1 }
  0xcf   : > { %v274_v0 = vsub.f32 %v1821_v14, %v255_v62 }
  0xd0   : > { %v1861_v2 = vpop.eup %1468  ;;  %v306_v3 = vmul.f32 1.442695, %v276_v61  ;;  %v304_v7 = vmul.f32 1.442695, %v275_v6 }
  0xd1   : > { %v1863_v4 = vpop.eup %1470  ;;  %v302_v5 = vmul.f32 1.442695, %v274_v0  ;;  %332 = vadd.xlane.f32.xlu0 %v1861_v2 }
  0xd2   : > { %1474 = vpow2.f32 %v306_v3  ;;  %328 = vadd.xlane.f32.xlu1 %v1863_v4  ;;  %v1869_v9 = vpop.eup %1472 }
  0xd3   : > { %1476 = vpow2.f32 %v302_v5  ;;  %324 = vadd.xlane.f32.xlu2 %v1858_v63 }
  0xd4   : > { %1478 = vpow2.f32 %v304_v7 }
  0xd6   : > { %v261_v8 = vpop.xlane.xlu0 %260 }
  0xd7   : > { %v277_v10 = vsub.f32 %v1826_v15, %v261_v8 }
  0xd8   : > { %v1872_v11 = vpop.eup %1474 }
  0xd9   : > { %v1874_v12 = vpop.eup %1476  ;;  %v308_v14 = vmul.f32 1.442695, %v277_v10  ;;  %338 = vadd.xlane.f32.xlu0 %v1872_v11 }
  0xda   : > { %334 = vadd.xlane.f32.xlu1 %v1874_v12  ;;  %v1879_v13 = vpop.eup %1478 }
  0xdb   : > { %1480 = vpow2.f32 %v308_v14  ;;  %330 = vadd.xlane.f32.xlu2 %v1869_v9 }
  0xe1   : > { %v1881_v16 = vpop.eup %1480 }
  0xe2   : > { %2663 = vst [vmem:[#allocation15_spill] sm:$0xff] %v1881_v16  ;;  %340 = vadd.xlane.f32.xlu1 %v1881_v16 }
  0xe3   : > { %336 = vadd.xlane.f32.xlu2 %v1879_v13 }
 0x12c   : > { %v315_v15 = vpop.xlane.xlu0 %314 }
 0x12d   : > { %v311_v17 = vpop.xlane.xlu1 %310  ;;  %1482 = vrcp.f32 %v315_v15  ;;  %v383_v32 = vand.u32 2147483648, %v315_v15  ;;  %vm377_vm1 = vweird.f32 %v315_v15  ;;  %v381_v38 = vand.u32 2147483647, %v315_v15 }
 0x12e   : > { %1484 = vrcp.f32 %v311_v17  ;;  %v353_v33 = vand.u32 2147483648, %v311_v17  ;;  %v351_v47 = vand.u32 2147483647, %v311_v17  ;;  %vm347_vm3 = vweird.f32 %v311_v17 }
 0x12f   : > { %v384_v51 = vor.u32 1.1754944e-38, %v383_v32  ;;  %vm1942_vm9 = vcmp.eq.f32.partialorder %v381_v38, 8.507059e+37 }
 0x130   : > { %v354_v55 = vor.u32 1.1754944e-38, %v353_v33  ;;  %vm352_vm7 = vcmp.eq.f32.partialorder %v351_v47, 8.507059e+37 }
 0x133   : > { %v1885_v18 = vpop.eup %1482 }
 0x134   : > { %v1485_v19 = vpop.eup %1484  ;;  %v373_v20 = vmul.f32 %v1885_v18, %v315_v15  ;;  %v1888_v21 = vpop.xlane.xlu0 %320  ;;  %vm378_vm4 = vweird.f32 %v1885_v18 }
 0x135   : > { %v343_v23 = vmul.f32 %v1485_v19, %v311_v17  ;;  %v1890_v24 = vpop.xlane.xlu1 %316  ;;  %vm348_vm2 = vweird.f32 %v1485_v19  ;;  %v428_v59 = vand.u32 2147483648, %v1888_v21  ;;  %vm1938_vm8 = vmor %vm377_vm1, %vm378_vm4  ;;  %vm603_vm4 = vcmp.ge.s32.totalorder %v1896_v27, %v1909_v39 }
 0x136   : > { %v1892_v25 = vpop.xlane.xlu2 %312  ;;  %1486 = vrcp.f32 %v1890_v24  ;;  %v374_v28 = vsub.f32 1.0, %v373_v20  ;;  %v398_v49 = vand.u32 2147483648, %v1890_v24  ;;  %vm349_vm6 = vmor %vm347_vm3, %vm348_vm2  ;;  %vm634_vm2 = vcmp.eq.s32.totalorder %v1896_v27, %v1929_v57 }
 0x137   : > { %v344_v26 = vsub.f32 1.0, %v343_v23  ;;  %1488 = vrcp.f32 %v1892_v25  ;;  %vm362_vm10 = vweird.f32 %v1892_v25  ;;  %v368_v5 = vand.u32 2147483648, %v1892_v25 }
 0x138   : > { %1490 = vrcp.f32 %v1888_v21  ;;  %v375_v36 = vmul.f32 %v1885_v18, %v374_v28  ;;  %v1946_v3 = vor.u32 1.1754944e-38, %v398_v49  ;;  %v1955_v15 = vor.u32 1.1754944e-38, %v428_v59 }
 0x139   : > { %v345_v30 = vmul.f32 %v1485_v19, %v344_v26  ;;  %v366_v20 = vand.u32 2147483647, %v1892_v25  ;;  %v369_v49 = vor.u32 1.1754944e-38, %v368_v5 }
 0x13a   : > { %v376_v60 = vadd.f32 %v1885_v18, %v375_v36 }
 0x13b   : > { %v346_v45 = vadd.f32 %v1485_v19, %v345_v30  ;;  %vm1989_vm13 = vcmp.eq.f32.partialorder %v366_v20, 8.507059e+37 }
 0x13c   : > { %v1903_v35 = vpop.eup %1486  ;;  %v1906_v37 = vpop.xlane.xlu0 %326  ;;  %v380_v22 = vsel %vm1938_vm8, %v1885_v18, %v376_v60 }
 0x13d   : > { %v1911_v40 = vpop.eup %1488  ;;  %v1915_v44 = vpop.xlane.xlu1 %322  ;;  %1492 = vrcp.f32 %v1906_v37  ;;  %v388_v53 = vmul.f32 %v1903_v35, %v1890_v24  ;;  %v350_v62 = vsel %vm349_vm6, %v1485_v19, %v346_v45  ;;  %v471_v26 = vand.u32 2147483647, %v1906_v37 }
 0x13e   : > { %v1913_v42 = vpop.xlane.xlu2 %318  ;;  %v1918_v48 = vpop.eup %1490  ;;  %v358_v50 = vmul.f32 %v1911_v40, %v1892_v25  ;;  %v355_v6 = vsel %vm352_vm7, %v354_v55, %v350_v62  ;;  %v443_v36 = vand.u32 2147483648, %v1915_v44  ;;  %v473_v45 = vand.u32 2147483648, %v1906_v37 }
 0x13f   : > { %1494 = vrcp.f32 %v1913_v42  ;;  %v418_v61 = vmul.f32 %v1918_v48, %v1888_v21  ;;  %v389_v8 = vsub.f32 1.0, %v388_v53  ;;  %v356_v14 = vmul.f32 %v1831_v34, %v355_v6 }
 0x140   : > { %v359_v58 = vsub.f32 1.0, %v358_v50  ;;  %1496 = vrcp.f32 %v1915_v44  ;;  %v413_v33 = vand.u32 2147483648, %v1913_v42  ;;  %vm363_vm12 = vweird.f32 %v1911_v40 }
 0x141   : > { %v419_v23 = vsub.f32 1.0, %v418_v61  ;;  %v617_v34 = vsel %vm601_vm0, %v356_v14, 0.0  ;;  %v390_v38 = vmul.f32 %v1903_v35, %v389_v8  ;;  %v1986_v50 = vadd.s32 72, %v1899_v29  ;;  %vm2017_vm0 = vmor %vm362_vm10, %vm363_vm12 }
 0x142   : > { %v360_v10 = vmul.f32 %v1911_v40, %v359_v58  ;;  %706 = vxpose.xlu0.b32.start [1/16] %v617_v34, 128  ;;  %vm467_vm14 = vweird.f32 %v1906_v37  ;;  %v385_v60 = vsel %vm1942_vm9, %v384_v51, %v380_v22  ;;  %v2005_v61 = vor.u32 1.1754944e-38, %v413_v33 }
 0x143   : > { %v1950_v7 = vpop.eup %1492  ;;  %v1996_v58 = vmul.f32 %v1918_v48, %v419_v23  ;;  %vm2008_vm15 = vcmp.eq.f32.partialorder %v471_v26, 8.507059e+37  ;;  %v649_v5 = vsel %vm633_vm5, %v356_v14, 0.0  ;;  %v2023_v51 = vor.u32 1.1754944e-38, %v443_v36 }
 0x144   : > { %v463_v17 = vmul.f32 %v1950_v7, %v1906_v37  ;;  %v1959_v19 = vpop.xlane.xlu0 %332  ;;  %v361_v47 = vadd.f32 %v1911_v40, %v360_v10  ;;  %v474_v8 = vor.u32 1.1754944e-38, %v473_v45  ;;  %vm468_vm1 = vweird.f32 %v1950_v7 }
 0x145   : > { %v1971_v30 = vpop.xlane.xlu1 %328  ;;  %1498 = vrcp.f32 %v1959_v19  ;;  %v1974_v32 = vpop.eup %1494  ;;  %v2041_v22 = vmul.f32 %v1829_v31, %v385_v60  ;;  %v2044_v23 = vmul.f32 %v649_v5, %v649_v5  ;;  %vm2061_vm5 = vmor %vm467_vm14, %vm468_vm1  ;;  %vm512_vm8 = vweird.f32 %v1959_v19 }
 0x146   : > { %v1969_v28 = vpop.xlane.xlu2 %324  ;;  %v464_v18 = vsub.f32 1.0, %v463_v17  ;;  %v1993_v55 = vpop.eup %1496  ;;  %v2000_v59 = vmul.f32 %v1974_v32, %v1913_v42  ;;  %v365_v10 = vsel %vm2017_vm0, %v1911_v40, %v361_v47  ;;  %v2029_v17 = vadd.f32 %v1903_v35, %v390_v38 }
 0x147   : > { %1500 = vrcp.f32 %v1969_v28  ;;  %v433_v25 = vmul.f32 %v1993_v55, %v1915_v44  ;;  %vm452_vm3 = vweird.f32 %v1969_v28  ;;  %v370_v31 = vsel %vm1989_vm13, %v369_v49, %v365_v10 }
 0x148   : > { %1502 = vrcp.f32 %v1971_v30  ;;  %v465_v62 = vmul.f32 %v1950_v7, %v464_v18  ;;  %v404_v40 = vsub.f32 1.0, %v2000_v59  ;;  %v456_v18 = vand.u32 2147483647, %v1969_v28 }
 0x149   : > { %vm482_vm6 = vweird.f32 %v1971_v30  ;;  %v371_v60 = vmul.f32 %v1840_v46, %v370_v31  ;;  %v486_v49 = vand.u32 2147483647, %v1971_v30  ;;  %v488_v53 = vand.u32 2147483648, %v1971_v30 }
 0x14a   : > { %v466_v36 = vadd.f32 %v1950_v7, %v465_v62  ;;  %vm635_vm10 = vcmp.eq.s32.totalorder %v1896_v27, %v1909_v39  ;;  %v516_v45 = vand.u32 2147483647, %v1959_v19  ;;  %v2120_v16 = vmul.f32 %v1974_v32, %v404_v40 }
 0x14b   : > { %v2021_v1 = vpop.eup %1498  ;;  %v618_v10 = vsel %vm602_vm11, %v371_v60, 0.0  ;;  %vm642_vm11 = vcmp.eq.s32.totalorder %v1896_v27, %v1986_v50  ;;  %vm2099_vm14 = vcmp.eq.f32.partialorder %v486_v49, 8.507059e+37  ;;  %vm2130_vm1 = vcmp.eq.f32.partialorder %v456_v18, 8.507059e+37 }
 0x14c   : > { %v508_v14 = vmul.f32 %v2021_v1, %v1959_v19  ;;  %v470_v46 = vsel %vm2061_vm5, %v1950_v7, %v466_v36  ;;  %vm513_vm9 = vweird.f32 %v2021_v1  ;;  %707 = vxpose.xlu0.b32.cont [2/16] %v618_v10, 128  ;;  %v2090_v7 = vpop.xlane.xlu0 %338  ;;  %vm2151_vm5 = vcmp.eq.f32.partialorder %v516_v45, 8.507059e+37 }
 0x14d   : > { %v2031_v20 = vpop.eup %1500  ;;  %v2071_v62 = vpop.xlane.xlu1 %334  ;;  %vm2113_vm0 = vmor %vm512_vm8, %vm513_vm9  ;;  %vm422_vm9 = vweird.f32 %v1888_v21 }
 0x14e   : > { %v448_v26 = vmul.f32 %v2031_v20, %v1969_v28  ;;  %v2049_v34 = vpop.xlane.xlu2 %330  ;;  %v1503_v33 = vpop.eup %1502  ;;  %v509_v38 = vsub.f32 1.0, %v508_v14  ;;  %v458_v14 = vand.u32 2147483648, %v1969_v28  ;;  %vm453_vm12 = vweird.f32 %v2031_v20 }
 0x14f   : > { %v478_v59 = vmul.f32 %v1503_v33, %v1971_v30  ;;  %vm483_vm7 = vweird.f32 %v1503_v33  ;;  %1504 = vrcp.f32 %v2049_v34  ;;  %v650_v28 = vsel %vm634_vm2, %v371_v60, 0.0 }
 0x150   : > { %v449_v47 = vsub.f32 1.0, %v448_v26  ;;  %v510_v6 = vmul.f32 %v2021_v1, %v509_v38  ;;  %v434_v26 = vsub.f32 1.0, %v433_v25  ;;  %1506 = vrcp.f32 %v2071_v62  ;;  %vm2095_vm13 = vmor %vm482_vm6, %vm483_vm7 }
 0x151   : > { %v479_v5 = vsub.f32 1.0, %v478_v59  ;;  %v489_v25 = vor.u32 1.1754944e-38, %v488_v53  ;;  %v475_v59 = vsel %vm2008_vm15, %v474_v8, %v470_v46  ;;  %vm2126_vm15 = vmor %vm452_vm3, %vm453_vm12  ;;  %1508 = vrcp.f32 %v2090_v7 }
 0x152   : > { %v450_v37 = vmul.f32 %v2031_v20, %v449_v47  ;;  %v518_v47 = vand.u32 2147483648, %v1959_v19  ;;  %v511_v30 = vadd.f32 %v2021_v1, %v510_v6  ;;  %v459_v19 = vor.u32 1.1754944e-38, %v458_v14 }
 0x153   : > { %v480_v38 = vmul.f32 %v1503_v33, %v479_v5  ;;  %vm392_vm3 = vweird.f32 %v1890_v24  ;;  %v2147_v18 = vmul.f32 %v1849_v54, %v475_v59  ;;  %v501_v45 = vand.u32 2147483647, %v2049_v34 }
 0x154   : > { %v451_v5 = vadd.f32 %v2031_v20, %v450_v37  ;;  %v2136_v37 = vmul.f32 %v1993_v55, %v434_v26  ;;  %v515_v60 = vsel %vm2113_vm0, %v2021_v1, %v511_v30  ;;  %vm497_vm2 = vweird.f32 %v2049_v34 }
 0x155   : > { %v481_v10 = vadd.f32 %v1503_v33, %v480_v38  ;;  %v2117_v53 = vpop.eup %1504  ;;  %v619_v38 = vsel %vm603_vm4, %v2041_v22, 0.0  ;;  %v2179_v59 = vpop.xlane.xlu1 %340  ;;  %vm407_vm4 = vweird.f32 %v1913_v42  ;;  %v533_v30 = vand.u32 2147483648, %v2071_v62 }
 0x156   : > { %v493_v6 = vmul.f32 %v2117_v53, %v2049_v34  ;;  %v2155_v26 = vpop.eup %1506  ;;  %v455_v57 = vsel %vm2126_vm15, %v2031_v20, %v451_v5  ;;  %v2167_v36 = vpop.xlane.xlu2 %336  ;;  %708 = vxpose.xlu0.b32.cont [3/16] %v619_v38, 128  ;;  %vm498_vm6 = vweird.f32 %v2117_v53  ;;  %vm2209_vm8 = vcmp.eq.f32.partialorder %v501_v45, 8.507059e+37 }
 0x157   : > { %v485_v40 = vsel %vm2095_vm13, %v1503_v33, %v481_v10  ;;  %v519_v33 = vor.u32 1.1754944e-38, %v518_v47  ;;  %v523_v20 = vmul.f32 %v2155_v26, %v2071_v62  ;;  %v503_v47 = vand.u32 2147483648, %v2049_v34  ;;  %v2181_v5 = vpop.eup %1508  ;;  %vm2205_vm7 = vmor %vm497_vm2, %vm498_vm6 }
 0x158   : > { %v490_v46 = vsel %vm2099_vm14, %v489_v25, %v485_v40  ;;  %v494_v54 = vsub.f32 1.0, %v493_v6  ;;  %v666_v25 = vmul.f32 %v650_v28, %v650_v28  ;;  %1510 = vrcp.f32 %v2167_v36 }
 0x159   : > { %v2170_v31 = vmul.f32 %v1863_v4, %v490_v46  ;;  %v460_v4 = vsel %vm2130_vm1, %v459_v19, %v455_v57  ;;  %v520_v10 = vsel %vm2151_vm5, %v519_v33, %v515_v60  ;;  %v524_v0 = vsub.f32 1.0, %v523_v20 }
 0x15a   : > { %v495_v1 = vmul.f32 %v2117_v53, %v494_v54  ;;  %v563_v40 = vand.u32 2147483648, %v2090_v7  ;;  %v651_v28 = vsel %vm635_vm10, %v2041_v22, 0.0  ;;  %v681_v19 = vadd.f32 %v666_v25, %v2044_v23 }
 0x15b   : > { %v658_v8 = vsel %vm642_vm11, %v2170_v31, 0.0  ;;  %1512 = vrcp.f32 %v2179_v59  ;;  %v2215_v39 = vmul.f32 %v1861_v2, %v520_v10  ;;  %v504_v22 = vor.u32 1.1754944e-38, %v503_v47 }
 0x15c   : > { %v496_v49 = vadd.f32 %v2117_v53, %v495_v1  ;;  %v531_v23 = vand.u32 2147483647, %v2071_v62  ;;  %v553_v14 = vmul.f32 %v2181_v5, %v2090_v7  ;;  %v2222_v34 = vmul.f32 %v1858_v63, %v460_v4 }
 0x15d   : > { %v2224_v33 = vor.u32 1.1754944e-38, %v533_v30  ;;  %v561_v57 = vand.u32 2147483647, %v2090_v7  ;;  %v667_v60 = vmul.f32 %v651_v28, %v651_v28  ;;  %v2227_v54 = vmul.f32 %v658_v8, %v658_v8 }
 0x15e   : > { %v500_v2 = vsel %vm2205_vm7, %v2117_v53, %v496_v49  ;;  %v525_v38 = vmul.f32 %v2155_v26, %v524_v0  ;;  %v2233_v25 = vor.u32 1.1754944e-38, %v563_v40  ;;  %v2235_v45 = vpop.eup %1510  ;;  %vm393_vm10 = vweird.f32 %v1903_v35 }
 0x15f   : > { %v682_v20 = vadd.f32 %v681_v19, %v667_v60  ;;  %v396_v63 = vand.u32 2147483647, %v1890_v24  ;;  %v586_v1 = vadd.s32 24, %v1899_v29  ;;  %vm437_vm12 = vweird.f32 %v1915_v44  ;;  %vm394_vm11 = vmor %vm392_vm3, %vm393_vm10 }
 0x160   : > { %v554_v47 = vsub.f32 1.0, %v553_v14  ;;  %v538_v4 = vmul.f32 %v2235_v45, %v2167_v36  ;;  %v546_v53 = vand.u32 2147483647, %v2167_v36  ;;  %v548_v10 = vand.u32 2147483648, %v2167_v36 }
 0x161   : > { %v2247_v30 = vpop.eup %1512  ;;  %v505_v49 = vsel %vm2209_vm8, %v504_v22, %v500_v2  ;;  %v576_v0 = vand.u32 2147483647, %v2179_v59  ;;  %v395_v40 = vsel %vm394_vm11, %v1903_v35, %v2029_v17  ;;  %vm397_vm13 = vcmp.eq.f32.partialorder %v396_v63, 8.507059e+37 }
 0x162   : > { %v2255_v28 = vadd.f32 %v2155_v26, %v525_v38  ;;  %vm527_vm14 = vweird.f32 %v2071_v62  ;;  %vm528_vm0 = vweird.f32 %v2155_v26  ;;  %v539_v24 = vsub.f32 1.0, %v538_v4 }
 0x163   : > { %v400_v8 = vsel %vm397_vm13, %v1946_v3, %v395_v40  ;;  %vm604_vm15 = vcmp.ge.s32.totalorder %v1896_v27, %v586_v1  ;;  %vm636_vm1 = vcmp.eq.s32.totalorder %v1896_v27, %v586_v1  ;;  %v406_v35 = vadd.f32 %v1974_v32, %v2120_v16 }
 0x164   : > { %v401_v19 = vmul.f32 %v1837_v43, %v400_v8  ;;  %vm408_vm3 = vweird.f32 %v1974_v32  ;;  %v540_v17 = vmul.f32 %v2235_v45, %v539_v24  ;;  %vm542_vm5 = vweird.f32 %v2167_v36 }
 0x165   : > { %v568_v6 = vmul.f32 %v2247_v30, %v2179_v59  ;;  %vm2272_vm2 = vmor %vm407_vm4, %vm408_vm3  ;;  %v411_v43 = vand.u32 2147483647, %v1913_v42  ;;  %v587_v46 = vadd.s32 32, %v1899_v29  ;;  %v421_v60 = vadd.f32 %v1918_v48, %v1996_v58 }
 0x166   : > { %v620_v16 = vsel %vm604_vm15, %v401_v19, 0.0  ;;  %v652_v22 = vsel %vm636_vm1, %v401_v19, 0.0  ;;  %v410_v14 = vsel %vm2272_vm2, %v1974_v32, %v406_v35  ;;  %v2284_v2 = vmul.f32 %v1869_v9, %v505_v49 }
 0x167   : > { %v555_v38 = vmul.f32 %v2181_v5, %v554_v47  ;;  %v2287_v63 = vor.u32 1.1754944e-38, %v548_v10  ;;  %709 = vxpose.xlu0.b32.cont [4/16] %v620_v16, 128  ;;  %vm412_vm6 = vcmp.eq.f32.partialorder %v411_v43, 8.507059e+37  ;;  %vm558_vm7 = vweird.f32 %v2181_v5 }
 0x168   : > { %vm543_vm8 = vweird.f32 %v2235_v45  ;;  %v415_v42 = vsel %vm412_vm6, %v2005_v61, %v410_v14  ;;  %vm637_vm10 = vcmp.eq.s32.totalorder %v1896_v27, %v587_v46  ;;  %vm423_vm11 = vweird.f32 %v1918_v48 }
 0x169   : > { %v2296_v9 = vadd.f32 %v2235_v45, %v540_v17  ;;  %v569_v32 = vsub.f32 1.0, %v568_v6  ;;  %v668_v58 = vmul.f32 %v652_v22, %v652_v22  ;;  %v416_v1 = vmul.f32 %v1846_v52, %v415_v42  ;;  %vm2301_vm13 = vmor %vm422_vm9, %vm423_vm11 }
 0x16a   : > { %vm2305_vm15 = vcmp.eq.f32.partialorder %v531_v23, 8.507059e+37  ;;  %v425_v61 = vsel %vm2301_vm13, %v1918_v48, %v421_v60  ;;  %v426_v10 = vand.u32 2147483647, %v1888_v21  ;;  %v588_v52 = vadd.s32 40, %v1899_v29 }
 0x16b   : > { %v436_v49 = vadd.f32 %v1993_v55, %v2136_v37  ;;  %vm2317_vm9 = vcmp.eq.f32.partialorder %v546_v53, 8.507059e+37  ;;  %vm605_vm3 = vcmp.ge.s32.totalorder %v1896_v27, %v587_v46  ;;  %v653_v23 = vsel %vm637_vm10, %v416_v1, 0.0  ;;  %vm2336_vm10 = vmor %vm527_vm14, %vm528_vm0 }
 0x16c   : > { %vm438_vm2 = vweird.f32 %v1993_v55  ;;  %v441_v24 = vand.u32 2147483647, %v1915_v44  ;;  %v683_v8 = vadd.f32 %v682_v20, %v668_v58  ;;  %v669_v48 = vmul.f32 %v653_v23, %v653_v23  ;;  %vm2361_vm14 = vmor %vm542_vm5, %vm543_vm8 }
 0x16d   : > { %vm427_vm6 = vcmp.eq.f32.partialorder %v426_v10, 8.507059e+37  ;;  %vm638_vm11 = vcmp.eq.s32.totalorder %v1896_v27, %v588_v52  ;;  %vm439_vm13 = vmor %vm437_vm12, %vm438_vm2  ;;  %v2330_v53 = vadd.s32 48, %v1899_v29  ;;  %vm2342_vm4 = vcmp.eq.f32.partialorder %v561_v57, 8.507059e+37 }
 0x16e   : > { %v430_v21 = vsel %vm427_vm6, %v1955_v15, %v425_v61  ;;  %v440_v37 = vsel %vm439_vm13, %v1993_v55, %v436_v49  ;;  %vm442_vm1 = vcmp.eq.f32.partialorder %v441_v24, 8.507059e+37  ;;  %v621_v15 = vsel %vm605_vm3, %v416_v1, 0.0 }
 0x16f   : > { %v431_v55 = vmul.f32 %v1835_v41, %v430_v21  ;;  %v445_v19 = vsel %vm442_vm1, %v2023_v51, %v440_v37  ;;  %v2349_v35 = vadd.s32 56, %v1899_v29  ;;  %v684_v17 = vadd.f32 %v683_v8, %v669_v48  ;;  %710 = vxpose.xlu0.b32.cont [5/16] %v621_v15, 128  ;;  %v2714_v15 = vld [vmem:[#allocation15_spill] sm:$0xff] }
 0x170   : > { %v446_v62 = vmul.f32 %v1851_v56, %v445_v19  ;;  %v2353_v6 = vadd.s32 64, %v1899_v29  ;;  %vm639_vm12 = vcmp.eq.s32.totalorder %v1896_v27, %v2330_v53  ;;  %v570_v51 = vmul.f32 %v2247_v30, %v569_v32 }
 0x171   : > { %v578_v57 = vand.u32 2147483648, %v2179_v59  ;;  %v654_v56 = vsel %vm638_vm11, %v431_v55, 0.0  ;;  %vm640_vm0 = vcmp.eq.s32.totalorder %v1896_v27, %v2349_v35  ;;  %v530_v3 = vsel %vm2336_vm10, %v2155_v26, %v2255_v28 }
 0x172   : > { %v670_v36 = vmul.f32 %v654_v56, %v654_v56  ;;  %vm641_vm5 = vcmp.eq.s32.totalorder %v1896_v27, %v2353_v6  ;;  %v655_v43 = vsel %vm639_vm12, %v446_v62, 0.0  ;;  %v556_v46 = vadd.f32 %v2181_v5, %v555_v38 }
 0x173   : > { %vm573_vm8 = vweird.f32 %v2247_v30  ;;  %vm606_vm1 = vcmp.ge.s32.totalorder %v1896_v27, %v588_v52  ;;  %v656_v16 = vsel %vm640_vm0, %v2222_v34, 0.0  ;;  %vm2706_vm3 = vweird.f32 %v2090_v7 }
 0x174   : > { %vm2385_vm2 = vmor %vm2706_vm3, %vm558_vm7  ;;  %v545_v26 = vsel %vm2361_vm14, %v2235_v45, %v2296_v9  ;;  %v685_v28 = vadd.f32 %v684_v17, %v670_v36  ;;  %v671_v14 = vmul.f32 %v655_v43, %v655_v43  ;;  %v672_v60 = vmul.f32 %v656_v16, %v656_v16 }
 0x175   : > { %v571_v38 = vadd.f32 %v2247_v30, %v570_v51  ;;  %v657_v42 = vsel %vm641_vm5, %v2147_v18, 0.0  ;;  %v2396_v32 = vadd.s32 80, %v1899_v29  ;;  %v2399_v7 = vadd.s32 88, %v1899_v29 }
 0x176   : > { %v535_v58 = vsel %vm2305_vm15, %v2224_v33, %v530_v3  ;;  %vm2709_vm7 = vweird.f32 %v2179_v59  ;;  %vm2412_vm11 = vcmp.eq.f32.partialorder %v576_v0, 8.507059e+37  ;;  %v622_v1 = vsel %vm606_vm1, %v431_v55, 0.0 }
 0x177   : > { %vm2406_vm6 = vmor %vm2709_vm7, %vm573_vm8  ;;  %v686_v47 = vadd.f32 %v685_v28, %v671_v14  ;;  %v550_v61 = vsel %vm2317_vm9, %v2287_v63, %v545_v26  ;;  %v560_v33 = vsel %vm2385_vm2, %v2181_v5, %v556_v46  ;;  %v2423_v4 = vadd.s32 96, %v1899_v29  ;;  %711 = vxpose.xlu0.b32.cont [6/16] %v622_v1, 128 }
 0x178   : > { %v2426_v10 = vadd.s32 104, %v1899_v29  ;;  %v579_v59 = vor.u32 1.1754944e-38, %v578_v57  ;;  %v673_v52 = vmul.f32 %v657_v42, %v657_v42  ;;  %vm643_vm15 = vcmp.eq.s32.totalorder %v1896_v27, %v2396_v32 }
 0x179   : > { %v687_v0 = vadd.f32 %v686_v47, %v672_v60  ;;  %vm607_vm9 = vcmp.ge.s32.totalorder %v1896_v27, %v2330_v53  ;;  %v575_v5 = vsel %vm2406_vm6, %v2247_v30, %v571_v38  ;;  %vm644_vm13 = vcmp.eq.s32.totalorder %v1896_v27, %v2399_v7 }
 0x17a   : > { %v659_v63 = vsel %vm643_vm15, %v2284_v2, 0.0  ;;  %v536_v40 = vmul.f32 %v1874_v12, %v535_v58  ;;  %v551_v23 = vmul.f32 %v1879_v13, %v550_v61  ;;  %v565_v24 = vsel %vm2342_vm4, %v2233_v25, %v560_v33 }
 0x17b   : > { %v688_v49 = vadd.f32 %v687_v0, %v673_v52  ;;  %v597_v8 = vadd.s32 112, %v1899_v29  ;;  %vm645_vm10 = vcmp.eq.s32.totalorder %v1896_v27, %v2423_v4  ;;  %vm646_vm12 = vcmp.eq.s32.totalorder %v1896_v27, %v2426_v10 }
 0x17c   : > { %v675_v30 = vmul.f32 %v659_v63, %v659_v63  ;;  %v580_v48 = vsel %vm2412_vm11, %v579_v59, %v575_v5  ;;  %v660_v12 = vsel %vm644_vm13, %v2215_v39, 0.0  ;;  %v598_v13 = vadd.s32 120, %v1899_v29 }
 0x17d   : > { %v689_v21 = vadd.f32 %v688_v49, %v2227_v54  ;;  %v623_v25 = vsel %vm607_vm9, %v446_v62, 0.0  ;;  %v566_v37 = vmul.f32 %v1872_v11, %v565_v24  ;;  %v661_v20 = vsel %vm645_vm10, %v536_v40, 0.0 }
 0x17e   : > { %v662_v44 = vsel %vm646_vm12, %v551_v23, 0.0  ;;  %v581_v55 = vmul.f32 %v2714_v15, %v580_v48  ;;  %vm647_vm4 = vcmp.eq.s32.totalorder %v1896_v27, %v597_v8  ;;  %v676_v19 = vmul.f32 %v660_v12, %v660_v12 }
 0x17f   : > { %v690_v17 = vadd.f32 %v689_v21, %v675_v30  ;;  %712 = vxpose.xlu0.b32.cont [7/16] %v623_v25, 128  ;;  %vm648_vm14 = vcmp.eq.s32.totalorder %v1896_v27, %v598_v13  ;;  %v677_v29 = vmul.f32 %v661_v20, %v661_v20  ;;  %v678_v41 = vmul.f32 %v662_v44, %v662_v44 }
 0x180   : > { %v663_v51 = vsel %vm647_vm4, %v566_v37, 0.0  ;;  %vm616_vm0 = vcmp.ge.s32.totalorder %v1896_v27, %v598_v13  ;;  %v664_v11 = vsel %vm648_vm14, %v581_v55, 0.0  ;;  %vm608_vm5 = vcmp.ge.s32.totalorder %v1896_v27, %v2349_v35 }
 0x181   : > { %v691_v54 = vadd.f32 %v690_v17, %v676_v19  ;;  %v632_v62 = vsel %vm616_vm0, %v581_v55, 0.0  ;;  %v679_v57 = vmul.f32 %v663_v51, %v663_v51  ;;  %v680_v3 = vmul.f32 %v664_v11, %v664_v11 }
 0x182   : > { %v624_v43 = vsel %vm608_vm5, %v2222_v34, 0.0  ;;  %vm609_vm8 = vcmp.ge.s32.totalorder %v1896_v27, %v2353_v6  ;;  %vm610_vm1 = vcmp.ge.s32.totalorder %v1896_v27, %v1986_v50  ;;  %vm611_vm3 = vcmp.ge.s32.totalorder %v1896_v27, %v2396_v32 }
 0x183   : > { %v692_v53 = vadd.f32 %v691_v54, %v677_v29  ;;  %v625_v16 = vsel %vm609_vm8, %v2147_v18, 0.0  ;;  %v626_v35 = vsel %vm610_vm1, %v2170_v31, 0.0  ;;  %v627_v34 = vsel %vm611_vm3, %v2284_v2, 0.0 }
 0x184   : > { %vm612_vm2 = vcmp.ge.s32.totalorder %v1896_v27, %v2399_v7  ;;  %vm613_vm7 = vcmp.ge.s32.totalorder %v1896_v27, %v2423_v4  ;;  %vm614_vm6 = vcmp.ge.s32.totalorder %v1896_v27, %v2426_v10  ;;  %vm615_vm11 = vcmp.ge.s32.totalorder %v1896_v27, %v597_v8 }
 0x185   : > { %v693_v56 = vadd.f32 %v692_v53, %v678_v41  ;;  %v628_v6 = vsel %vm612_vm2, %v2215_v39, 0.0  ;;  %v629_v18 = vsel %vm613_vm7, %v536_v40, 0.0  ;;  %v630_v50 = vsel %vm614_vm6, %v551_v23, 0.0 }
 0x186   : > { %v631_v31 = vsel %vm615_vm11, %v566_v37, 0.0 }
 0x187   : > { %v694_v36 = vadd.f32 %v693_v56, %v679_v57  ;;  %713 = vxpose.xlu0.b32.cont [8/16] %v624_v43, 128 }
 0x189   : > { %v695_v46 = vadd.f32 %v694_v36, %v680_v3 }
 0x18b   : > { %696 = vadd.xlane.f32.xlu2 %v695_v46 }
 0x18f   : > { %714 = vxpose.xlu0.b32.cont [9/16] %v625_v16, 128 }
 0x197   : > { %715 = vxpose.xlu0.b32.cont [10/16] %v626_v35, 128 }
 0x19f   : > { %716 = vxpose.xlu0.b32.cont [11/16] %v627_v34, 128 }
 0x1a7   : > { %717 = vxpose.xlu0.b32.cont [12/16] %v628_v6, 128 }
 0x1af   : > { %718 = vxpose.xlu0.b32.cont [13/16] %v629_v18, 128 }
 0x1b7   : > { %719 = vxpose.xlu0.b32.cont [14/16] %v630_v50, 128 }
 0x1bf   : > { %720 = vxpose.xlu0.b32.cont [15/16] %v631_v31, 128 }
 0x1c7   : > { %721 = vxpose.xlu0.b32.end [16/16] %v632_v62, 128 }
 0x1f3   : > { %v722_v2 = vpop.trf.xlu0 }
 0x1f4   : > { %738 = vst [vmem:[#allocation2 + $0x30] sm:$0xff] %v722_v2 }
 0x1fb   : > { %v723_v22 = vpop.trf.xlu0 }
 0x1fc   : > { %739 = vst [vmem:[#allocation2] sm:$0xff] %v723_v22 }
 0x1fe   : > { %v697_v39 = vpop.xlane.xlu2 %696 }
 0x1ff   : > { %v698_v26 = vrot.slane %v697_v39, 4 }
 0x201   : > { %v699_v28 = vadd.f32 %v698_v26, %v697_v39 }
 0x203   : > { %v700_v14 = vrot.slane %v699_v28, 2  ;;  %v724_v60 = vpop.trf.xlu0 }
 0x204   : > { %740 = vst [vmem:[#allocation2 + $0x58] sm:$0xff] %v724_v60 }
 0x205   : > { %v701_v38 = vadd.f32 %v700_v14, %v699_v28 }
 0x207   : > { %v702_v42 = vrot.slane %v701_v38, 1 }
 0x209   : > { %v703_v32 = vadd.f32 %v702_v42, %v701_v38 }
 0x20b   : > { %1378 = vpush %v703_v32  ;;  %v725_v7 = vpop.trf.xlu0 }
 0x20c   : > { %741 = vst [vmem:[#allocation2 + $0x18] sm:$0xff] %v725_v7 }
 0x213   : > { %v726_v27 = vpop.trf.xlu0 }
 0x214   : > { %742 = vst [vmem:[#allocation2 + $0x50] sm:$0xff] %v726_v27 }
 0x21b   : > { %v727_v58 = vpop.trf.xlu0 }
 0x21c   : > { %743 = vst [vmem:[#allocation2 + $0x68] sm:$0xff] %v727_v58 }
 0x223   : > { %v728_v45 = vpop.trf.xlu0 }
 0x224   : > { %744 = vst [vmem:[#allocation2 + $0x8] sm:$0xff] %v728_v45 }
 0x22b   : > { %v729_v9 = vpop.trf.xlu0 }
 0x22c   : > { %745 = vst [vmem:[#allocation2 + $0x48] sm:$0xff] %v729_v9 }
 0x233   : > { %v730_v1 = vpop.trf.xlu0 }
 0x234   : > { %746 = vst [vmem:[#allocation2 + $0x40] sm:$0xff] %v730_v1 }
 0x23b   : > { %v731_v47 = vpop.trf.xlu0 }
 0x23c   : > { %s1379_s18 = spop %1378  ;;  %747 = vst [vmem:[#allocation2 + $0x20] sm:$0xff] %v731_v47 }
 0x23d   : > { %s705_s17 = sadd.f32 128.0, %s1379_s18 }
 0x23f   : > { %755 = sst [smem:[#allocation10]] %s705_s17 }
 0x243   : > { %v732_v61 = vpop.trf.xlu0 }
 0x244   : > { %748 = vst [vmem:[#allocation2 + $0x10] sm:$0xff] %v732_v61 }
 0x24b   : > { %v733_v33 = vpop.trf.xlu0 }
 0x24c   : > { %749 = vst [vmem:[#allocation2 + $0x38] sm:$0xff] %v733_v33 }
 0x253   : > { %v734_v4 = vpop.trf.xlu0 }
 0x254   : > { %750 = vst [vmem:[#allocation2 + $0x60] sm:$0xff] %v734_v4 }
 0x25b   : > { %v735_v10 = vpop.trf.xlu0 }
 0x25c   : > { %751 = vst [vmem:[#allocation2 + $0x70] sm:$0xff] %v735_v10 }
 0x263   : > { %v736_v59 = vpop.trf.xlu0 }
 0x264   : > { %752 = vst [vmem:[#allocation2 + $0x78] sm:$0xff] %v736_v59 }
 0x26b   : > { %v737_v0 = vpop.trf.xlu0 }
 0x26c   : > { %753 = vst [vmem:[#allocation2 + $0x28] sm:$0xff] %v737_v0 }
 0x26d PF: > { %v1332_v52 = vld [vmem:[%s1795_s25 + $0x1f0] sm:$0xff]  ;;  %v1333_v5 = vld [vmem:[%s1795_s25 + $0x1f8] sm:$0xff]  ;;  %v1330_v63 = vld [vmem:[%s1795_s25 + $0x1e0] sm:$0xff]  ;;  %s1191_s24 = sshll.u32 %s2654_s3, 4  ;;  %s1669_s27 = smov [#allocation10]   ;;  %s1192_s24 = int_to_ptr.hbm [resolvable:$true] %s1191_s24 }
 0x26e   : > { %999 = vmatpush.msra.mxu2 %v1332_v52  ;;  %1064 = vmatpush.msra.mxu3 %v1333_v5  ;;  %v1331_v49 = vld [vmem:[%s1795_s25 + $0x1e8] sm:$0xff]  ;;  %v1328_v40 = vld [vmem:[%s1795_s25 + $0x1d0] sm:$0xff]  ;;  %v1329_v23 = vld [vmem:[%s1795_s25 + $0x1d8] sm:$0xff]  ;;  %p2715_p1 = scmp.eq.s32.totalorder %s1713_s16, 3  ;;  %s1377_s28 = sshll.u32 %s1713_s16, 9 }
 0x26f   : > { %v802_v24 = vld [vmem:[%s1795_s25 + $0xf0] sm:$0xff]  ;;  %v803_v8 = vld [vmem:[%s1795_s25 + $0xf8] sm:$0xff]  ;;  %v800_v30 = vld [vmem:[%s1795_s25 + $0xe0] sm:$0xff]  ;;  %s1175_s7 = scalar_lea.hbm %s2653_s2, %s1377_s28  ;;  %s1176_s8 = sshll.u32 %s1801_s23, 4  ;;  %s1177_s8 = int_to_ptr.vmem [resolvable:$true] %s1176_s8 }
 0x270   : > { %1000 = vmatpush.msra.mxu2 %v1330_v63  ;;  %1065 = vmatpush.msra.mxu3 %v1331_v49  ;;  %v801_v48 = vld [vmem:[%s1795_s25 + $0xe8] sm:$0xff]  ;;  %v1326_v12 = vld [vmem:[%s1795_s25 + $0x1c0] sm:$0xff]  ;;  %v798_v21 = vld [vmem:[%s1795_s25 + $0xd0] sm:$0xff]  ;;  %1388 = dma.smem_to_hbm (%p2715_p1), %s1669_s27, 16, %s1192_s24, [#allocation6]  }
 0x271   : > { %804 = vmatpush.msra.mxu0 %v802_v24  ;;  %869 = vmatpush.msra.mxu1 %v803_v8  ;;  %v1327_v13 = vld [vmem:[%s1795_s25 + $0x1c8] sm:$0xff]  ;;  %v799_v25 = vld [vmem:[%s1795_s25 + $0xd8] sm:$0xff]  ;;  %v1324_v37 = vld [vmem:[%s1795_s25 + $0x1b0] sm:$0xff]  ;;  %s1178_s6 = sshll.u32 %s1175_s7, 4  ;;  %s1163_s9 = scalar_lea.sflag [#allocation5], %s1791_s10  ;;  %s1179_s6 = int_to_ptr.hbm [resolvable:$true] %s1178_s6 }
 0x272   : > { %1001 = vmatpush.msra.mxu2 %v1328_v40  ;;  %1066 = vmatpush.msra.mxu3 %v1329_v23  ;;  %v1325_v20 = vld [vmem:[%s1795_s25 + $0x1b8] sm:$0xff]  ;;  %v796_v44 = vld [vmem:[%s1795_s25 + $0xc0] sm:$0xff]  ;;  %v797_v15 = vld [vmem:[%s1795_s25 + $0xc8] sm:$0xff]  ;;  %s1602_s11 = sshra.s32 %s1179_s6, 4  ;;  %s1608_s17 = scalar_lea.hbm %s2653_s2, 2048  ;;  %s1603_s11 = int_to_ptr.hbm [resolvable:$true] %s1602_s11 }
 0x273   : > { %805 = vmatpush.msra.mxu0 %v800_v30  ;;  %870 = vmatpush.msra.mxu1 %v801_v48  ;;  %v1322_v55 = vld [vmem:[%s1795_s25 + $0x1a0] sm:$0xff]  ;;  %v1323_v19 = vld [vmem:[%s1795_s25 + $0x1a8] sm:$0xff]  ;;  %v794_v17 = vld [vmem:[%s1795_s25 + $0xb0] sm:$0xff]  ;;  %s1604_s20 = scalar_lea.hbm %s1603_s11, 512  ;;  %p1609_p10 = scmp.lt.s32.totalorder %s1603_s11, %s2653_s2 }
 0x274   : > { %1002 = vmatpush.msra.mxu2 %v1326_v12  ;;  %1067 = vmatpush.msra.mxu3 %v1327_v13  ;;  %v795_v29 = vld [vmem:[%s1795_s25 + $0xb8] sm:$0xff]  ;;  %v1320_v41 = vld [vmem:[%s1795_s25 + $0x190] sm:$0xff]  ;;  %v792_v51 = vld [vmem:[%s1795_s25 + $0xa0] sm:$0xff]  ;;  %p1605_p4 = scmp.ne.s32.totalorder %s1603_s11, %s1604_s20  ;;  %p1610_p11 = scmp.lt.s32.totalorder %s1608_s17, %s1604_s20 }
 0x275   : > { %806 = vmatpush.msra.mxu0 %v798_v21  ;;  %871 = vmatpush.msra.mxu1 %v799_v25  ;;  %v1321_v54 = vld [vmem:[%s1795_s25 + $0x198] sm:$0xff]  ;;  %v793_v53 = vld [vmem:[%s1795_s25 + $0xa8] sm:$0xff]  ;;  %v1318_v62 = vld [vmem:[%s1795_s25 + $0x180] sm:$0xff] }
 0x276   : > { %1003 = vmatpush.msra.mxu2 %v1324_v37  ;;  %1068 = vmatpush.msra.mxu3 %v1325_v20  ;;  %v1319_v11 = vld [vmem:[%s1795_s25 + $0x188] sm:$0xff]  ;;  %v790_v57 = vld [vmem:[%s1795_s25 + $0x90] sm:$0xff]  ;;  %v791_v56 = vld [vmem:[%s1795_s25 + $0x98] sm:$0xff]  ;;  %p1606_p8 = pnand %p1605_p4, %p1759_p7  ;;  %p1611_p12 = por %p1610_p11, %p1609_p10 }
 0x277   : > { %807 = vmatpush.msra.mxu0 %v796_v44  ;;  %872 = vmatpush.msra.mxu1 %v797_v15  ;;  %v1316_v3 = vld [vmem:[%s1795_s25 + $0x170] sm:$0xff]  ;;  %v1317_v36 = vld [vmem:[%s1795_s25 + $0x178] sm:$0xff]  ;;  %v788_v43 = vld [vmem:[%s1795_s25 + $0x80] sm:$0xff] }
 0x278   : > { %1004 = vmatpush.msra.mxu2 %v1322_v55  ;;  %1069 = vmatpush.msra.mxu3 %v1323_v19  ;;  %v789_v46 = vld [vmem:[%s1795_s25 + $0x88] sm:$0xff]  ;;  %v1314_v16 = vld [vmem:[%s1795_s25 + $0x160] sm:$0xff]  ;;  %v786_v34 = vld [vmem:[%s1795_s25 + $0x70] sm:$0xff]  ;;  %p1607_p9 = pneg %p1606_p8 }
 0x279   : > { %808 = vmatpush.msra.mxu0 %v794_v17  ;;  %873 = vmatpush.msra.mxu1 %v795_v29  ;;  %v1315_v35 = vld [vmem:[%s1795_s25 + $0x168] sm:$0xff]  ;;  %v787_v6 = vld [vmem:[%s1795_s25 + $0x78] sm:$0xff]  ;;  %v1312_v18 = vld [vmem:[%s1795_s25 + $0x150] sm:$0xff] }
 0x27a   : > { %1005 = vmatpush.msra.mxu2 %v1320_v41  ;;  %1070 = vmatpush.msra.mxu3 %v1321_v54  ;;  %v1313_v50 = vld [vmem:[%s1795_s25 + $0x158] sm:$0xff]  ;;  %v784_v31 = vld [vmem:[%s1795_s25 + $0x60] sm:$0xff]  ;;  %v785_v2 = vld [vmem:[%s1795_s25 + $0x68] sm:$0xff]  ;;  %p1612_p13 = pnand %p1611_p12, %p1607_p9 }
 0x27b   : > { %809 = vmatpush.msra.mxu0 %v792_v51  ;;  %874 = vmatpush.msra.mxu1 %v793_v53  ;;  %v1310_v22 = vld [vmem:[%s1795_s25 + $0x140] sm:$0xff]  ;;  %v1311_v39 = vld [vmem:[%s1795_s25 + $0x148] sm:$0xff]  ;;  %v782_v26 = vld [vmem:[%s1795_s25 + $0x50] sm:$0xff] }
 0x27c   : > { %1006 = vmatpush.msra.mxu2 %v1318_v62  ;;  %1071 = vmatpush.msra.mxu3 %v1319_v11  ;;  %v783_v28 = vld [vmem:[%s1795_s25 + $0x58] sm:$0xff]  ;;  %v1308_v14 = vld [vmem:[%s1795_s25 + $0x130] sm:$0xff]  ;;  %v780_v38 = vld [vmem:[%s1795_s25 + $0x40] sm:$0xff] }
 0x27d   : > { %810 = vmatpush.msra.mxu0 %v790_v57  ;;  %875 = vmatpush.msra.mxu1 %v791_v56  ;;  %v1309_v60 = vld [vmem:[%s1795_s25 + $0x138] sm:$0xff]  ;;  %v781_v42 = vld [vmem:[%s1795_s25 + $0x48] sm:$0xff]  ;;  %v1306_v32 = vld [vmem:[%s1795_s25 + $0x120] sm:$0xff] }
 0x27e   : > { %1007 = vmatpush.msra.mxu2 %v1316_v3  ;;  %1072 = vmatpush.msra.mxu3 %v1317_v36  ;;  %v1307_v7 = vld [vmem:[%s1795_s25 + $0x128] sm:$0xff]  ;;  %v778_v27 = vld [vmem:[%s1795_s25 + $0x30] sm:$0xff]  ;;  %v779_v58 = vld [vmem:[%s1795_s25 + $0x38] sm:$0xff] }
 0x27f   : > { %811 = vmatpush.msra.mxu0 %v788_v43  ;;  %876 = vmatpush.msra.mxu1 %v789_v46  ;;  %v1304_v45 = vld [vmem:[%s1795_s25 + $0x110] sm:$0xff]  ;;  %v1305_v9 = vld [vmem:[%s1795_s25 + $0x118] sm:$0xff]  ;;  %v776_v1 = vld [vmem:[%s1795_s25 + $0x20] sm:$0xff] }
 0x280   : > { %1008 = vmatpush.msra.mxu2 %v1314_v16  ;;  %1073 = vmatpush.msra.mxu3 %v1315_v35  ;;  %v777_v47 = vld [vmem:[%s1795_s25 + $0x28] sm:$0xff]  ;;  %v1302_v61 = vld [vmem:[%s1795_s25 + $0x100] sm:$0xff]  ;;  %v756_v4 = vld [vmem:[#allocation2 + $0x30] sm:$0xff] }
 0x281   : > { %812 = vmatpush.msra.mxu0 %v786_v34  ;;  %877 = vmatpush.msra.mxu1 %v787_v6  ;;  %v1303_v33 = vld [vmem:[%s1795_s25 + $0x108] sm:$0xff]  ;;  %v774_v10 = vld [vmem:[%s1795_s25 + $0x10] sm:$0xff]  ;;  %v775_v59 = vld [vmem:[%s1795_s25 + $0x18] sm:$0xff] }
 0x282   : > { %1009 = vmatpush.msra.mxu2 %v1312_v18  ;;  %1074 = vmatpush.msra.mxu3 %v1313_v50  ;;  %v772_v0 = vld [vmem:[%s1795_s25] sm:$0xff]  ;;  %v773_v52 = vld [vmem:[%s1795_s25 + $0x8] sm:$0xff]  ;;  %v758_v63 = vld [vmem:[#allocation2 + $0x58] sm:$0xff] }
 0x283   : > { %813 = vmatpush.msra.mxu0 %v784_v31  ;;  %878 = vmatpush.msra.mxu1 %v785_v2  ;;  %v757_v5 = vld [vmem:[#allocation2] sm:$0xff]  ;;  %v759_v49 = vld [vmem:[#allocation2 + $0x18] sm:$0xff]  ;;  %v760_v40 = vld [vmem:[#allocation2 + $0x50] sm:$0xff] }
 0x284   : > { %1010 = vmatpush.msra.mxu2 %v1310_v22  ;;  %1075 = vmatpush.msra.mxu3 %v1311_v39  ;;  %v761_v23 = vld [vmem:[#allocation2 + $0x68] sm:$0xff]  ;;  %v764_v30 = vld [vmem:[#allocation2 + $0x40] sm:$0xff]  ;;  %v766_v12 = vld [vmem:[#allocation2 + $0x10] sm:$0xff] }
 0x285   : > { %814 = vmatpush.msra.mxu0 %v782_v26  ;;  %879 = vmatpush.msra.mxu1 %v783_v28  ;;  %v762_v24 = vld [vmem:[#allocation2 + $0x8] sm:$0xff]  ;;  %v765_v48 = vld [vmem:[#allocation2 + $0x20] sm:$0xff]  ;;  %v767_v13 = vld [vmem:[#allocation2 + $0x38] sm:$0xff] }
 0x286   : > { %1011 = vmatpush.msra.mxu2 %v1308_v14  ;;  %1076 = vmatpush.msra.mxu3 %v1309_v60  ;;  %v763_v8 = vld [vmem:[#allocation2 + $0x48] sm:$0xff]  ;;  %v768_v21 = vld [vmem:[#allocation2 + $0x60] sm:$0xff]  ;;  %v769_v25 = vld [vmem:[#allocation2 + $0x70] sm:$0xff] }
 0x287   : > { %815 = vmatpush.msra.mxu0 %v780_v38  ;;  %880 = vmatpush.msra.mxu1 %v781_v42  ;;  %v770_v37 = vld [vmem:[#allocation2 + $0x78] sm:$0xff]  ;;  %v771_v20 = vld [vmem:[#allocation2 + $0x28] sm:$0xff] }
 0x288   : > { %1012 = vmatpush.msra.mxu2 %v1306_v32  ;;  %1077 = vmatpush.msra.mxu3 %v1307_v7 }
 0x289   : > { %816 = vmatpush.msra.mxu0 %v778_v27  ;;  %881 = vmatpush.msra.mxu1 %v779_v58 }
 0x28a   : > { %1013 = vmatpush.msra.mxu2 %v1304_v45  ;;  %1078 = vmatpush.msra.mxu3 %v1305_v9 }
 0x28b   : > { %817 = vmatpush.msra.mxu0 %v776_v1  ;;  %882 = vmatpush.msra.mxu1 %v777_v47 }
 0x28c   : > { %1014 = vmatpush.msra.mxu2 %v1302_v61  ;;  %1079 = vmatpush.msra.mxu3 %v1303_v33 }
 0x28d   : > { %1015 = vmatmul.f32.vlgmr.msra.gmra.mxu2 %v756_v4  ;;  %1080 = vmatmul.f32.vlgmr.msra.gmra.mxu3 %v756_v4 }
 0x28e   : > { %818 = vmatpush.msra.mxu0 %v774_v10  ;;  %883 = vmatpush.msra.mxu1 %v775_v59 }
 0x290   : > { %819 = vmatpush.msra.mxu0 %v772_v0  ;;  %884 = vmatpush.msra.mxu1 %v773_v52 }
 0x291   : > { %820 = vmatmul.f32.vlgmr.msra.gmra.mxu0 %v756_v4  ;;  %885 = vmatmul.f32.vlgmr.msra.gmra.mxu1 %v756_v4 }
 0x295   : > { %1018 = vmatmul.f32.gmra.mxu2 %v757_v5  ;;  %1083 = vmatmul.f32.gmra.mxu3 %v757_v5 }
 0x299   : > { %823 = vmatmul.f32.gmra.mxu0 %v757_v5  ;;  %888 = vmatmul.f32.gmra.mxu1 %v757_v5 }
 0x29d   : > { %1021 = vmatmul.f32.gmra.mxu2 %v758_v63  ;;  %1086 = vmatmul.f32.gmra.mxu3 %v758_v63 }
 0x2a1   : > { %826 = vmatmul.f32.gmra.mxu0 %v758_v63  ;;  %891 = vmatmul.f32.gmra.mxu1 %v758_v63 }
 0x2a5   : > { %1024 = vmatmul.f32.gmra.mxu2 %v759_v49  ;;  %1089 = vmatmul.f32.gmra.mxu3 %v759_v49 }
 0x2a9   : > { %829 = vmatmul.f32.gmra.mxu0 %v759_v49  ;;  %894 = vmatmul.f32.gmra.mxu1 %v759_v49 }
 0x2ad   : > { %1027 = vmatmul.f32.gmra.mxu2 %v760_v40  ;;  %1092 = vmatmul.f32.gmra.mxu3 %v760_v40 }
 0x2b1   : > { %832 = vmatmul.f32.gmra.mxu0 %v760_v40  ;;  %897 = vmatmul.f32.gmra.mxu1 %v760_v40 }
 0x2b5   : > { %1030 = vmatmul.f32.gmra.mxu2 %v761_v23  ;;  %1095 = vmatmul.f32.gmra.mxu3 %v761_v23 }
 0x2b9   : > { %835 = vmatmul.f32.gmra.mxu0 %v761_v23  ;;  %900 = vmatmul.f32.gmra.mxu1 %v761_v23 }
 0x2bd   : > { %1033 = vmatmul.f32.gmra.mxu2 %v762_v24  ;;  %1098 = vmatmul.f32.gmra.mxu3 %v762_v24 }
 0x2c1   : > { %838 = vmatmul.f32.gmra.mxu0 %v762_v24  ;;  %903 = vmatmul.f32.gmra.mxu1 %v762_v24 }
 0x2c5   : > { %1036 = vmatmul.f32.gmra.mxu2 %v763_v8  ;;  %1101 = vmatmul.f32.gmra.mxu3 %v763_v8 }
 0x2c9   : > { %841 = vmatmul.f32.gmra.mxu0 %v763_v8  ;;  %906 = vmatmul.f32.gmra.mxu1 %v763_v8 }
 0x2cd   : > { %1039 = vmatmul.f32.gmra.mxu2 %v764_v30  ;;  %1104 = vmatmul.f32.gmra.mxu3 %v764_v30 }
 0x2d1   : > { %844 = vmatmul.f32.gmra.mxu0 %v764_v30  ;;  %909 = vmatmul.f32.gmra.mxu1 %v764_v30 }
 0x2d5   : > { %1042 = vmatmul.f32.gmra.mxu2 %v765_v48  ;;  %1107 = vmatmul.f32.gmra.mxu3 %v765_v48 }
 0x2d9   : > { %847 = vmatmul.f32.gmra.mxu0 %v765_v48  ;;  %912 = vmatmul.f32.gmra.mxu1 %v765_v48 }
 0x2dd   : > { %1045 = vmatmul.f32.gmra.mxu2 %v766_v12  ;;  %1110 = vmatmul.f32.gmra.mxu3 %v766_v12 }
 0x2e1   : > { %850 = vmatmul.f32.gmra.mxu0 %v766_v12  ;;  %915 = vmatmul.f32.gmra.mxu1 %v766_v12 }
 0x2e5   : > { %1048 = vmatmul.f32.gmra.mxu2 %v767_v13  ;;  %1113 = vmatmul.f32.gmra.mxu3 %v767_v13 }
 0x2e9   : > { %853 = vmatmul.f32.gmra.mxu0 %v767_v13  ;;  %918 = vmatmul.f32.gmra.mxu1 %v767_v13 }
 0x2ed   : > { %1051 = vmatmul.f32.gmra.mxu2 %v768_v21  ;;  %1116 = vmatmul.f32.gmra.mxu3 %v768_v21 }
 0x2f1   : > { %856 = vmatmul.f32.gmra.mxu0 %v768_v21  ;;  %921 = vmatmul.f32.gmra.mxu1 %v768_v21 }
 0x2f5   : > { %1054 = vmatmul.f32.gmra.mxu2 %v769_v25  ;;  %1119 = vmatmul.f32.gmra.mxu3 %v769_v25 }
 0x2f9   : > { %859 = vmatmul.f32.gmra.mxu0 %v769_v25  ;;  %924 = vmatmul.f32.gmra.mxu1 %v769_v25 }
 0x2fd   : > { %1057 = vmatmul.f32.gmra.mxu2 %v770_v37  ;;  %1122 = vmatmul.f32.gmra.mxu3 %v770_v37 }
 0x301   : > { %862 = vmatmul.f32.gmra.mxu0 %v770_v37  ;;  %927 = vmatmul.f32.gmra.mxu1 %v770_v37 }
 0x305   : > { %1060 = vmatmul.f32.gmra.mxu2 %v771_v20  ;;  %1125 = vmatmul.f32.gmra.mxu3 %v771_v20 }
 0x309   : > { %865 = vmatmul.f32.gmra.mxu0 %v771_v20  ;;  %930 = vmatmul.f32.gmra.mxu1 %v771_v20 }
 0x30e   : > { %v821_v44 = vpop.f32.mrf.mxu0  ;;  %v886_v15 = vpop.f32.mrf.mxu1 }
 0x30f   : > { %934 = vst [vmem:[%s1801_s23] sm:$0xff] %v821_v44 }
 0x310   : > { %935 = vst [vmem:[%s1801_s23 + $0x8] sm:$0xff] %v886_v15  ;;  %v1016_v55 = vpop.f32.mrf.mxu2  ;;  %v1081_v19 = vpop.f32.mrf.mxu3 }
 0x311   : > { %1334 = vst [vmem:[%s1801_s23 + $0x100] sm:$0xff] %v1016_v55 }
 0x312   : > { %1335 = vst [vmem:[%s1801_s23 + $0x108] sm:$0xff] %v1081_v19 }
 0x316   : > { %v824_v17 = vpop.f32.mrf.mxu0  ;;  %v889_v29 = vpop.f32.mrf.mxu1 }
 0x317   : > { %936 = vst [vmem:[%s1801_s23 + $0x10] sm:$0xff] %v824_v17 }
 0x318   : > { %937 = vst [vmem:[%s1801_s23 + $0x18] sm:$0xff] %v889_v29  ;;  %v1019_v41 = vpop.f32.mrf.mxu2  ;;  %v1084_v54 = vpop.f32.mrf.mxu3 }
 0x319   : > { %1336 = vst [vmem:[%s1801_s23 + $0x110] sm:$0xff] %v1019_v41 }
 0x31a   : > { %1337 = vst [vmem:[%s1801_s23 + $0x118] sm:$0xff] %v1084_v54 }
 0x31e   : > { %v827_v51 = vpop.f32.mrf.mxu0  ;;  %v892_v53 = vpop.f32.mrf.mxu1 }
 0x31f   : > { %938 = vst [vmem:[%s1801_s23 + $0x20] sm:$0xff] %v827_v51 }
 0x320   : > { %939 = vst [vmem:[%s1801_s23 + $0x28] sm:$0xff] %v892_v53  ;;  %v1022_v62 = vpop.f32.mrf.mxu2  ;;  %v1087_v11 = vpop.f32.mrf.mxu3 }
 0x321   : > { %1338 = vst [vmem:[%s1801_s23 + $0x120] sm:$0xff] %v1022_v62 }
 0x322   : > { %1339 = vst [vmem:[%s1801_s23 + $0x128] sm:$0xff] %v1087_v11 }
 0x326   : > { %v830_v57 = vpop.f32.mrf.mxu0  ;;  %v895_v56 = vpop.f32.mrf.mxu1 }
 0x327   : > { %940 = vst [vmem:[%s1801_s23 + $0x30] sm:$0xff] %v830_v57 }
 0x328   : > { %941 = vst [vmem:[%s1801_s23 + $0x38] sm:$0xff] %v895_v56  ;;  %v1025_v3 = vpop.f32.mrf.mxu2  ;;  %v1090_v36 = vpop.f32.mrf.mxu3 }
 0x329   : > { %1340 = vst [vmem:[%s1801_s23 + $0x130] sm:$0xff] %v1025_v3 }
 0x32a   : > { %1341 = vst [vmem:[%s1801_s23 + $0x138] sm:$0xff] %v1090_v36 }
 0x32e   : > { %v833_v43 = vpop.f32.mrf.mxu0  ;;  %v898_v46 = vpop.f32.mrf.mxu1 }
 0x32f   : > { %942 = vst [vmem:[%s1801_s23 + $0x40] sm:$0xff] %v833_v43 }
 0x330   : > { %943 = vst [vmem:[%s1801_s23 + $0x48] sm:$0xff] %v898_v46  ;;  %v1028_v16 = vpop.f32.mrf.mxu2  ;;  %v1093_v35 = vpop.f32.mrf.mxu3 }
 0x331   : > { %1342 = vst [vmem:[%s1801_s23 + $0x140] sm:$0xff] %v1028_v16 }
 0x332   : > { %1343 = vst [vmem:[%s1801_s23 + $0x148] sm:$0xff] %v1093_v35 }
 0x336   : > { %v836_v34 = vpop.f32.mrf.mxu0  ;;  %v901_v6 = vpop.f32.mrf.mxu1 }
 0x337   : > { %944 = vst [vmem:[%s1801_s23 + $0x50] sm:$0xff] %v836_v34 }
 0x338   : > { %945 = vst [vmem:[%s1801_s23 + $0x58] sm:$0xff] %v901_v6  ;;  %v1031_v18 = vpop.f32.mrf.mxu2  ;;  %v1096_v50 = vpop.f32.mrf.mxu3 }
 0x339   : > { %1344 = vst [vmem:[%s1801_s23 + $0x150] sm:$0xff] %v1031_v18 }
 0x33a   : > { %1345 = vst [vmem:[%s1801_s23 + $0x158] sm:$0xff] %v1096_v50 }
 0x33e   : > { %v839_v31 = vpop.f32.mrf.mxu0  ;;  %v904_v2 = vpop.f32.mrf.mxu1 }
 0x33f   : > { %946 = vst [vmem:[%s1801_s23 + $0x60] sm:$0xff] %v839_v31 }
 0x340   : > { %947 = vst [vmem:[%s1801_s23 + $0x68] sm:$0xff] %v904_v2  ;;  %v1034_v22 = vpop.f32.mrf.mxu2  ;;  %v1099_v39 = vpop.f32.mrf.mxu3 }
 0x341   : > { %1346 = vst [vmem:[%s1801_s23 + $0x160] sm:$0xff] %v1034_v22 }
 0x342   : > { %1347 = vst [vmem:[%s1801_s23 + $0x168] sm:$0xff] %v1099_v39 }
 0x346   : > { %v842_v26 = vpop.f32.mrf.mxu0  ;;  %v907_v28 = vpop.f32.mrf.mxu1 }
 0x347   : > { %948 = vst [vmem:[%s1801_s23 + $0x70] sm:$0xff] %v842_v26 }
 0x348   : > { %949 = vst [vmem:[%s1801_s23 + $0x78] sm:$0xff] %v907_v28  ;;  %v1037_v14 = vpop.f32.mrf.mxu2  ;;  %v1102_v60 = vpop.f32.mrf.mxu3 }
 0x349   : > { %1348 = vst [vmem:[%s1801_s23 + $0x170] sm:$0xff] %v1037_v14 }
 0x34a   : > { %1349 = vst [vmem:[%s1801_s23 + $0x178] sm:$0xff] %v1102_v60 }
 0x34e   : > { %v845_v38 = vpop.f32.mrf.mxu0  ;;  %v910_v42 = vpop.f32.mrf.mxu1 }
 0x34f   : > { %950 = vst [vmem:[%s1801_s23 + $0x80] sm:$0xff] %v845_v38 }
 0x350   : > { %951 = vst [vmem:[%s1801_s23 + $0x88] sm:$0xff] %v910_v42  ;;  %v1040_v32 = vpop.f32.mrf.mxu2  ;;  %v1105_v7 = vpop.f32.mrf.mxu3 }
 0x351   : > { %1350 = vst [vmem:[%s1801_s23 + $0x180] sm:$0xff] %v1040_v32 }
 0x352   : > { %1351 = vst [vmem:[%s1801_s23 + $0x188] sm:$0xff] %v1105_v7 }
 0x356   : > { %v848_v27 = vpop.f32.mrf.mxu0  ;;  %v913_v58 = vpop.f32.mrf.mxu1 }
 0x357   : > { %952 = vst [vmem:[%s1801_s23 + $0x90] sm:$0xff] %v848_v27 }
 0x358   : > { %953 = vst [vmem:[%s1801_s23 + $0x98] sm:$0xff] %v913_v58  ;;  %v1043_v45 = vpop.f32.mrf.mxu2  ;;  %v1108_v9 = vpop.f32.mrf.mxu3 }
 0x359   : > { %1352 = vst [vmem:[%s1801_s23 + $0x190] sm:$0xff] %v1043_v45 }
 0x35a   : > { %1353 = vst [vmem:[%s1801_s23 + $0x198] sm:$0xff] %v1108_v9 }
 0x35e   : > { %v851_v1 = vpop.f32.mrf.mxu0  ;;  %v916_v47 = vpop.f32.mrf.mxu1 }
 0x35f   : > { %954 = vst [vmem:[%s1801_s23 + $0xa0] sm:$0xff] %v851_v1 }
 0x360   : > { %955 = vst [vmem:[%s1801_s23 + $0xa8] sm:$0xff] %v916_v47  ;;  %v1046_v61 = vpop.f32.mrf.mxu2  ;;  %v1111_v33 = vpop.f32.mrf.mxu3 }
 0x361   : > { %1354 = vst [vmem:[%s1801_s23 + $0x1a0] sm:$0xff] %v1046_v61 }
 0x362   : > { %1355 = vst [vmem:[%s1801_s23 + $0x1a8] sm:$0xff] %v1111_v33 }
 0x366   : > { %v854_v4 = vpop.f32.mrf.mxu0  ;;  %v919_v10 = vpop.f32.mrf.mxu1 }
 0x367   : > { %956 = vst [vmem:[%s1801_s23 + $0xb0] sm:$0xff] %v854_v4 }
 0x368   : > { %957 = vst [vmem:[%s1801_s23 + $0xb8] sm:$0xff] %v919_v10  ;;  %v1049_v59 = vpop.f32.mrf.mxu2  ;;  %v1114_v0 = vpop.f32.mrf.mxu3 }
 0x369   : > { %1356 = vst [vmem:[%s1801_s23 + $0x1b0] sm:$0xff] %v1049_v59 }
 0x36a   : > { %1357 = vst [vmem:[%s1801_s23 + $0x1b8] sm:$0xff] %v1114_v0 }
 0x36e   : > { %v857_v52 = vpop.f32.mrf.mxu0  ;;  %v922_v5 = vpop.f32.mrf.mxu1 }
 0x36f   : > { %958 = vst [vmem:[%s1801_s23 + $0xc0] sm:$0xff] %v857_v52 }
 0x370   : > { %959 = vst [vmem:[%s1801_s23 + $0xc8] sm:$0xff] %v922_v5  ;;  %v1052_v63 = vpop.f32.mrf.mxu2  ;;  %v1117_v49 = vpop.f32.mrf.mxu3 }
 0x371   : > { %1358 = vst [vmem:[%s1801_s23 + $0x1c0] sm:$0xff] %v1052_v63 }
 0x372   : > { %1359 = vst [vmem:[%s1801_s23 + $0x1c8] sm:$0xff] %v1117_v49 }
 0x376   : > { %v860_v40 = vpop.f32.mrf.mxu0  ;;  %v925_v23 = vpop.f32.mrf.mxu1 }
 0x377   : > { %960 = vst [vmem:[%s1801_s23 + $0xd0] sm:$0xff] %v860_v40 }
 0x378   : > { %961 = vst [vmem:[%s1801_s23 + $0xd8] sm:$0xff] %v925_v23  ;;  %v1055_v24 = vpop.f32.mrf.mxu2  ;;  %v1120_v8 = vpop.f32.mrf.mxu3 }
 0x379   : > { %1360 = vst [vmem:[%s1801_s23 + $0x1d0] sm:$0xff] %v1055_v24 }
 0x37a   : > { %1361 = vst [vmem:[%s1801_s23 + $0x1d8] sm:$0xff] %v1120_v8 }
 0x37e   : > { %v863_v30 = vpop.f32.mrf.mxu0  ;;  %v928_v48 = vpop.f32.mrf.mxu1 }
 0x37f   : > { %962 = vst [vmem:[%s1801_s23 + $0xe0] sm:$0xff] %v863_v30 }
 0x380   : > { %963 = vst [vmem:[%s1801_s23 + $0xe8] sm:$0xff] %v928_v48  ;;  %v1058_v12 = vpop.f32.mrf.mxu2  ;;  %v1123_v13 = vpop.f32.mrf.mxu3 }
 0x381   : > { %1362 = vst [vmem:[%s1801_s23 + $0x1e0] sm:$0xff] %v1058_v12 }
 0x382   : > { %1363 = vst [vmem:[%s1801_s23 + $0x1e8] sm:$0xff] %v1123_v13 }
 0x386   : > { %v866_v21 = vpop.f32.mrf.mxu0  ;;  %v931_v25 = vpop.f32.mrf.mxu1 }
 0x387   : > { %964 = vst [vmem:[%s1801_s23 + $0xf0] sm:$0xff] %v866_v21 }
 0x388   : > { %965 = vst [vmem:[%s1801_s23 + $0xf8] sm:$0xff] %v931_v25  ;;  %v1061_v37 = vpop.f32.mrf.mxu2  ;;  %v1126_v20 = vpop.f32.mrf.mxu3 }
 0x389   : > { %1364 = vst [vmem:[%s1801_s23 + $0x1f0] sm:$0xff] %v1061_v37 }
 0x38a   : > { %1365 = vst [vmem:[%s1801_s23 + $0x1f8] sm:$0xff] %v1126_v20 }
 0x38b   : > { %1615 = shalt.err (!%p1612_p13)
}
 0x38c   : > { %s1670_s10 = smov 256   ;;  %s1671_s23 = smov 16  }
 0x38d   : > { %1386 = dma.vmem_to_hbm [thread:$0]  (%p1759_p7), %s1177_s8, 8192, %s1179_s6, %s1163_s9, %s1670_s10, %s1670_s10, %s1671_s23  }
 0x38e   : > { %p2716_p0 = pmov %p2715_p1 }
 0x390   : > { %1641 = dma.done.wait (%p2716_p0), [#allocation6], 16   ;;  %p2717_p3 = pmov %p2716_p0 }
 0x392   : > { %1643 = vsyncadd (%p2717_p3), [#allocation6], 4294967280 }
 0x393   : > { %1200 = sfence }
 0x394 PF: > { %p1409_p5 = scmp.ge.s32.totalorder %s1662_s15, 2  ;;  %s1209_s24 = sand.u32 1, %s1650_s12  }
 0x395   : > { %s1210_s27 = scalar_lea.sflag [#allocation5], %s1209_s24 }
 0x396   : > { %p1401_p2 = pnand %p1409_p5, %p1727_p6 }
 0x398   : > { %p1402_p1 = pneg %p1401_p2 }
 0x39a   : > { %1645 = dma.done.wait (%p1402_p1), %s1210_s27, 8192  }
 0x39b   : > { %1647 = vsyncadd (%p1402_p1), %s1210_s27, 4294959104  ;;  %p19_p7 = scmp.ge.s32.totalorder %s1745_s26, 6   ;;  %s2718_s12 = smov %s1654_s13 }
 0x39c   : > { %s2719_s13 = smov %s1658_s14  ;;  %s2720_s14 = smov %s1755_s4 }
 0x39d   : > { %s2721_s15 = smov %s1745_s26  ;;  %21 = sbr.rel (!%p19_p7) target bundleno = 7 (0x7), region = 94 }
 0x3a2   :  { %1216 = vsyncpa [#allocation4], 1 }
 0x3a3   :  { %1218 = vsyncpa [#allocation4 + $0x1], 1 }
 0x3a4   :  { %1219 = vsyncpa [#allocation8], 1 }
 0x3a5   :  { %1221 = vsyncpa [#allocation8 + $0x1], 1 }
 0x3a6   :  { %1222 = vsyncpa [#allocation5], 1 }
 0x3a7   :  { %1224 = vsyncpa [#allocation5 + $0x1], 1 }
 0x3a8   :  { %1225 = vsyncpa [#allocation6], 1 }
 0x3a9   :  { %1227 = vsyncpa [#allocation6 + $0x1], 1 }

</bundles_post_ra>
